<compile_context>
chip_gen: v6e
topology: v6e:2x2x1
jax: 0.10.0
libtpu: 0.0.40
codegen_flags: <defaults>
</compile_context>

<pallas_src>
import jax
import jax.numpy as jnp
from jax import lax
from jax.experimental import pallas as pl
from jax.experimental.pallas import tpu as pltpu

GROUPS = 16          # GroupNorm(16, ...) in the PyTorch module
EPS = 1e-5           # PyTorch GroupNorm default eps


# ----------------------------- kernel factory --------------------------------

def _tc_count():
    """How many TensorCores a 'parallel' grid axis can use on this chip."""
    try:
        kind = jax.devices()[0].device_kind.lower()
    except Exception:
        return 1
    return 2 if any(t in kind for t in ("v7", "7x", "v4", "v5p")) else 1


def _make_kernel(B, H, W, gn1_diag, inv_cnt1):
    HW = H * W
    BHW = B * HW

    def persample_colsum(v):
        # v: (B*HW, C) f32 -> (B, C) per-sample column sums (2D static slices only).
        if B == 1:
            return jnp.sum(v, axis=0, keepdims=True)
        return jnp.concatenate(
            [jnp.sum(v[b * HW:(b + 1) * HW], axis=0, keepdims=True)
             for b in range(B)], axis=0)

    def gn_relu(y, p_ref, agg_ref, inv_cnt):
        """GroupNorm (+ReLU) on a (B*HW, C) slab with per-sample statistics."""
        C = y.shape[-1]
        gamma, beta = p_ref[1:2, :], p_ref[2:3, :]
        ysq = y * y
        # Single column reduce of [y | y*y] when it fits in 128 lanes.
        if 2 * C <= 128:
            st = persample_colsum(jnp.concatenate([y, ysq], axis=1))   # (B, 2C)
            s, ss = st[:, :C], st[:, C:]
        else:
            s, ss = persample_colsum(y), persample_colsum(ysq)
        if agg_ref is None:
            # cpg == 1: group-average map is diagonal -> plain scalar scale.
            mean, msq = s * inv_cnt, ss * inv_cnt
        else:
            # One stacked (2B, C) @ (C, C) stat matmul instead of two.
            r = jnp.dot(jnp.concatenate([s, ss], axis=0), agg_ref[...],
                        preferred_element_type=jnp.float32)
            mean, msq = r[:B], r[B:]
        var = jnp.maximum(msq - mean * mean, 0.0)        # clamp f32 cancellation
        scale = lax.rsqrt(var + EPS) * gamma             # (B, C)
        shift = beta - mean * scale                      # (B, C)
        # Fused affine: one multiply + one add over the slab, then ReLU.
        if B == 1:
            return jnp.maximum(y * scale + shift, 0.0)
        return jnp.concatenate(
            [jnp.maximum(y[b * HW:(b + 1) * HW] * scale[b:b + 1] + shift[b:b + 1],
                         0.0) for b in range(B)], axis=0)

    def kernel(x_ref, mask_ref, w1_ref, p1_ref, *rest):
        if gn1_diag:
            wp_ref, p2_ref, agg2_ref, w3_ref, p3_ref, agg3_ref, out_ref = rest
            agg1_ref = None
        else:
            (agg1_ref, wp_ref, p2_ref, agg2_ref, w3_ref, p3_ref, agg3_ref,
             out_ref) = rest

        # --- conv1 (1x1) -> GN -> ReLU -------------------------------------
        y = jnp.dot(x_ref[...], w1_ref[...],
                    preferred_element_type=jnp.float32) + p1_ref[0:1, :]
        y = gn_relu(y, p1_ref, agg1_ref, inv_cnt1)

        # --- ConvTranspose2d(k=3, s=2, p=1, op=1) as ONE packed matmul ------
        #   out[2i,2j]     = x[i,j]@W[1,1]
        #   out[2i,2j+1]   = x[i,j]@W[1,2] + x[i,j+1]@W[1,0]
        #   out[2i+1,2j]   = x[i,j]@W[2,1] + x[i+1,j]@W[0,1]
        #   out[2i+1,2j+1] = x[i,j]@W[2,2] + x[i,j+1]@W[2,0]
        #                  + x[i+1,j]@W[0,2] + x[i+1,j+1]@W[0,0]
        # LHS lane blocks = [y | x(i,j+1) | x(i+1,j) | x(i+1,j+1)].  The first
        # block needs no mask; the three rolled copies are masked in bf16.  The
        # flat roll also wraps across samples when B > 1, but every wrapped row
        # is a boundary row (j == W-1 or i == H-1) and is zeroed by the mask.
        rolled = jnp.concatenate(
            [pltpu.roll(y, BHW - 1, axis=0),        # x[i, j+1]
             pltpu.roll(y, BHW - W, axis=0),        # x[i+1, j]
             pltpu.roll(y, BHW - W - 1, axis=0)],   # x[i+1, j+1]
            axis=1)
        a = jnp.concatenate(
            [y.astype(jnp.bfloat16),
             rolled.astype(jnp.bfloat16) * mask_ref[...]], axis=1)

        # Packed matmul: column blocks of wp are output parities [ee|eo|oe|oo].
        z = jnp.dot(a, wp_ref[...],
                    preferred_element_type=jnp.float32) + p2_ref[0:1, :]
        z = gn_relu(z, p2_ref, agg2_ref, None)

        # --- conv3 (1x1, block-diag over parities) -> GN -> ReLU ------------
        o = jnp.dot(z.astype(jnp.bfloat16), w3_ref[...],
                    preferred_element_type=jnp.float32) + p3_ref[0:1, :]
        o = gn_relu(o, p3_ref, agg3_ref, None)

        out_ref[...] = o.astype(out_ref.dtype)     # lane-dense bf16 store

    return kernel


# --------------------------------- wrapper ------------------------------------

def _group_avg(c_packed, channels, groups, count):
    """Pre-scaled (C_packed, C_packed) group-average map for the packed layout."""
    cpg = channels // groups
    lane = jnp.arange(c_packed)
    grp = (lane % channels) // cpg
    return (grp[:, None] == grp[None, :]).astype(jnp.float32) / float(count)


def decoder_block(x_nchw, p):
    """x_nchw: (N, Cin, H, W) float32 -> (N, n_filters, 2H, 2W) float32."""
    N, Cin, H, W = x_nchw.shape
    Cmid = p["w1"].shape[1]
    Cout = p["w3"].shape[1]
    HW = H * W
    cpg1 = Cmid // GROUPS
    gn1_diag = cpg1 == 1

    # Samples per grid block: fold the whole batch into rows on single-TC chips
    # (v5e/v6e -> one grid step, M = N*HW); split the batch across the two
    # TensorCores on v7x-class chips via a "parallel" grid axis.
    ntc = _tc_count()
    nblk = ntc if (ntc > 1 and N >= ntc and N % ntc == 0) else 1
    B = N // nblk
    BHW = B * HW

    # NCHW -> (N*HW, Cin); bf16 MXU operands (f32 accumulation in-kernel).
    x = jnp.transpose(x_nchw, (0, 2, 3, 1)).reshape(N * HW, Cin).astype(jnp.bfloat16)
    w1b = p["w1"].astype(jnp.bfloat16)
    p1 = jnp.concatenate([p["b1"], p["g1"], p["be1"]], axis=0)        # (3, Cmid)

    # PyTorch deconv weight (Cin, Cout, kH, kW) -> taps dw[kh, kw] of (Cmid, Cmid),
    # packed into one (4*Cmid, 4*Cmid) block matrix; columns = [ee|eo|oe|oo].
    dw = jnp.transpose(p["wt2"], (2, 3, 0, 1))
    zz = jnp.zeros((Cmid, Cmid), jnp.float32)
    wp = jnp.block([
        [dw[1, 1], dw[1, 2], dw[2, 1], dw[2, 2]],
        [zz,       dw[1, 0], zz,       dw[2, 0]],
        [zz,       zz,       dw[0, 1], dw[0, 2]],
        [zz,       zz,       zz,       dw[0, 0]],
    ]).astype(jnp.bfloat16)
    p2 = jnp.concatenate([jnp.tile(p["db"], (1, 4)),
                          jnp.tile(p["g2"], (1, 4)),
                          jnp.tile(p["be2"], (1, 4))], axis=0)        # (3, 4*Cmid)

    # conv3 per parity: block-diagonal weight, lane-tiled bias/affine.
    w3bd = jnp.kron(jnp.eye(4, dtype=jnp.float32), p["w3"]).astype(jnp.bfloat16)
    p3 = jnp.concatenate([jnp.tile(p["b3"], (1, 4)),
                          jnp.tile(p["g3"], (1, 4)),
                          jnp.tile(p["be3"], (1, 4))], axis=0)        # (3, 4*Cout)

    # Pre-scaled GroupNorm group-average maps (f32 trace-time constants).
    agg2 = _group_avg(4 * Cmid, Cmid, GROUPS, 4 * HW * (Cmid // GROUPS))
    agg3 = _group_avg(4 * Cout, Cout, GROUPS, 4 * HW * (Cout // GROUPS))

    # Boundary masks for the THREE rolled deconv taps (first tap needs none);
    # exact 0/1 so bf16 is lossless.  Tiled per sample within a block.
    ii = jnp.arange(HW)
    col_ok = ((ii % W) != (W - 1)).astype(jnp.float32)   # x[i, j+1] exists
    row_ok = (ii < (HW - W)).astype(jnp.float32)         # x[i+1, j] exists
    mask = jnp.repeat(jnp.stack([col_ok, row_ok, col_ok * row_ok], axis=1),
                      Cmid, axis=1)                      # (HW, 3*Cmid)
    mask = jnp.tile(mask, (B, 1)).astype(jnp.bfloat16)   # (B*HW, 3*Cmid)

    kernel = _make_kernel(B, H, W, gn1_diag, 1.0 / float(HW * cpg1))

    def full(arr):
        nd = arr.ndim
        return pl.BlockSpec(arr.shape, lambda n, _nd=nd: (0,) * _nd)

    operands = [x, mask, w1b, p1]
    in_specs = [pl.BlockSpec((BHW, Cin), lambda n: (n, 0)),
                full(mask), full(w1b), full(p1)]
    if not gn1_diag:
        agg1 = _group_avg(Cmid, Cmid, GROUPS, HW * cpg1)
        operands.append(agg1)
        in_specs.append(full(agg1))
    operands += [wp, p2, agg2, w3bd, p3, agg3]
    in_specs += [full(wp), full(p2), full(agg2), full(w3bd), full(p3), full(agg3)]

    out = pl.pallas_call(
        kernel,
        out_shape=jax.ShapeDtypeStruct((N * HW, 4 * Cout), jnp.bfloat16),
        grid_spec=pltpu.PrefetchScalarGridSpec(
            num_scalar_prefetch=0,
            grid=(nblk,),
            in_specs=in_specs,
            out_specs=pl.BlockSpec((BHW, 4 * Cout), lambda n: (n, 0)),
        ),
        compiler_params=pltpu.CompilerParams(dimension_semantics=("parallel",)),
    )(*operands)

    # (N*HW, [row_parity, col_parity, Cout]) -> NCHW (N, Cout, 2H, 2W).
    # Parity unpack done in bf16 (halves transpose traffic), final cast to f32.
    y = out.reshape(N, H, W, 2, 2, Cout).transpose(0, 1, 3, 2, 4, 5)
    y = y.reshape(N, 2 * H, 2 * W, Cout)
    return jnp.transpose(y, (0, 3, 1, 2)).astype(jnp.float32)


# ----------------------------- params & reference -----------------------------

def init_params(key, in_channels, n_filters):
    cmid = in_channels // 4
    ks = jax.random.split(key, 12)
    rnd = lambda k, s, scale=0.1: scale * jax.random.normal(k, s, jnp.float32)
    return {
        "w1": rnd(ks[0], (in_channels, cmid)),
        "b1": rnd(ks[1], (1, cmid)),
        "g1": 1.0 + rnd(ks[2], (1, cmid)),
        "be1": rnd(ks[3], (1, cmid)),
        "wt2": rnd(ks[4], (cmid, cmid, 3, 3)),   # PyTorch ConvTranspose2d layout
        "db": rnd(ks[5], (1, cmid)),
        "g2": 1.0 + rnd(ks[6], (1, cmid)),
        "be2": rnd(ks[7], (1, cmid)),
        "w3": rnd(ks[8], (cmid, n_filters)),
        "b3": rnd(ks[9], (1, n_filters)),
        "g3": 1.0 + rnd(ks[10], (1, n_filters)),
        "be3": rnd(ks[11], (1, n_filters)),
    }


def _gn_ref(y, gamma, beta, groups):
    N, H, W, C = y.shape
    cpg = C // groups
    yg = y.reshape(N, H, W, groups, cpg)
    mean = yg.mean(axis=(1, 2, 4), keepdims=True)
    var = ((yg - mean) ** 2).mean(axis=(1, 2, 4), keepdims=True)
    yn = (yg - mean) / jnp.sqrt(var + EPS)
    return yn.reshape(N, H, W, C) * gamma + beta


def reference(x_nchw, p):
    x = jnp.transpose(x_nchw, (0, 2, 3, 1))  # NHWC
    y = jnp.einsum("nhwc,cd->nhwd", x, p["w1"]) + p["b1"][0]
    y = jnp.maximum(_gn_ref(y, p["g1"][0], p["be1"][0], GROUPS), 0.0)
    # ConvTranspose2d == lhs-dilated conv with spatially-flipped kernel.
    wt = p["wt2"]
    w_lax = jnp.transpose(wt[:, :, ::-1, ::-1], (2, 3, 0, 1))  # HWIO
    y = lax.conv_general_dilated(
        y, w_lax, window_strides=(1, 1), padding=((1, 2), (1, 2)),
        lhs_dilation=(2, 2), dimension_numbers=("NHWC", "HWIO", "NHWC"))
    y = y + p["db"][0]
    y = jnp.maximum(_gn_ref(y, p["g2"][0], p["be2"][0], GROUPS), 0.0)
    y = jnp.einsum("nhwc,cd->nhwd", y, p["w3"]) + p["b3"][0]
    y = jnp.maximum(_gn_ref(y, p["g3"][0], p["be3"][0], GROUPS), 0.0)
    return jnp.transpose(y, (0, 3, 1, 2))


# ----------------------------------- main --------------------------------------

if __name__ == "__main__":
    N, Cin, H, W = 2, 64, 8, 8          # in_channels=64 -> mid=16; groups=16 ok
    n_filters = 32

    key = jax.random.PRNGKey(0)
    kx, kp = jax.random.split(key)
    x = jax.random.normal(kx, (N, Cin, H, W), jnp.float32)
    params = init_params(kp, Cin, n_filters)

    out = jax.block_until_ready(jax.jit(decoder_block)(x, params))
    assert out.shape == (N, n_filters, 2 * H, 2 * W), out.shape

    ref = jax.block_until_ready(reference(x, params))
    # bf16 MXU operands / bf16 output store with f32 accumulation: allow
    # bf16-level tolerance vs the pure-f32 reference; structural bugs produce
    # O(1) errors and are still caught.
    if not jnp.allclose(out, ref, atol=5e-2, rtol=5e-2):
        raise RuntimeError(
            f"mismatch: max abs diff = {float(jnp.max(jnp.abs(out - ref)))}")

    print("KERNEL_OK")
</pallas_src>

<mosaic_0001>
module attributes {stable_mosaic.version = 11 : i64} {
  func.func @kernel(%arg0: i32, %arg1: memref<128x64xbf16, #tpu.memory_space<vmem>>, %arg2: memref<128x48xbf16, #tpu.memory_space<vmem>>, %arg3: memref<64x16xbf16, #tpu.memory_space<vmem>>, %arg4: memref<3x16xf32, #tpu.memory_space<vmem>>, %arg5: memref<64x64xbf16, #tpu.memory_space<vmem>>, %arg6: memref<3x64xf32, #tpu.memory_space<vmem>>, %arg7: memref<64x64xf32, #tpu.memory_space<vmem>>, %arg8: memref<64x128xbf16, #tpu.memory_space<vmem>>, %arg9: memref<3x128xf32, #tpu.memory_space<vmem>>, %arg10: memref<128x128xf32, #tpu.memory_space<vmem>>, %arg11: memref<128x128xbf16, #tpu.memory_space<vmem>>) attributes {dimension_semantics = [#tpu.dimension_semantics<parallel>], iteration_bounds = array<i64: 1>, scalar_prefetch = 0 : i64, scratch_operands = 0 : i64, tpu.core_type = #tpu.core_type<tc>, window_params = [{transform_indices = @transform_0, window_bounds = array<i64: 128, 64>}, {pipeline_mode = #tpu.pipeline_mode<synchronous>, transform_indices = @transform_1, window_bounds = array<i64: 128, 48>}, {pipeline_mode = #tpu.pipeline_mode<synchronous>, transform_indices = @transform_2, window_bounds = array<i64: 64, 16>}, {pipeline_mode = #tpu.pipeline_mode<synchronous>, transform_indices = @transform_3, window_bounds = array<i64: 3, 16>}, {pipeline_mode = #tpu.pipeline_mode<synchronous>, transform_indices = @transform_4, window_bounds = array<i64: 64, 64>}, {pipeline_mode = #tpu.pipeline_mode<synchronous>, transform_indices = @transform_5, window_bounds = array<i64: 3, 64>}, {pipeline_mode = #tpu.pipeline_mode<synchronous>, transform_indices = @transform_6, window_bounds = array<i64: 64, 64>}, {pipeline_mode = #tpu.pipeline_mode<synchronous>, transform_indices = @transform_7, window_bounds = array<i64: 64, 128>}, {pipeline_mode = #tpu.pipeline_mode<synchronous>, transform_indices = @transform_8, window_bounds = array<i64: 3, 128>}, {pipeline_mode = #tpu.pipeline_mode<synchronous>, transform_indices = @transform_9, window_bounds = array<i64: 128, 128>}, {transform_indices = @transform_10, window_bounds = array<i64: 128, 128>}]} {
    %c0 = arith.constant 0 : index
    %c0_0 = arith.constant 0 : index
    %0 = vector.load %arg1[%c0, %c0_0] : memref<128x64xbf16, #tpu.memory_space<vmem>>, vector<128x64xbf16>
    %c0_1 = arith.constant 0 : index
    %c0_2 = arith.constant 0 : index
    %1 = vector.load %arg3[%c0_1, %c0_2] : memref<64x16xbf16, #tpu.memory_space<vmem>>, vector<64x16xbf16>
    %cst = arith.constant dense<0.000000e+00> : vector<128x16xf32>
    %2 = tpu.matmul %0, %1, %cst {dimension_numbers = #tpu.dot_dimension_numbers<[1], [0], [0], [1], [0, 0, 1, 1], [], []>} : vector<128x64xbf16>, vector<64x16xbf16>, vector<128x16xf32> -> vector<128x16xf32>
    %c0_3 = arith.constant 0 : index
    %c0_4 = arith.constant 0 : index
    %3 = vector.load %arg4[%c0_3, %c0_4] : memref<3x16xf32, #tpu.memory_space<vmem>>, vector<1x16xf32>
    %4 = vector.broadcast %3 : vector<1x16xf32> to vector<128x16xf32>
    %5 = arith.addf %2, %4 : vector<128x16xf32>
    %c1 = arith.constant 1 : index
    %c0_5 = arith.constant 0 : index
    %6 = vector.load %arg4[%c1, %c0_5] : memref<3x16xf32, #tpu.memory_space<vmem>>, vector<1x16xf32>
    %c2 = arith.constant 2 : index
    %c0_6 = arith.constant 0 : index
    %7 = vector.load %arg4[%c2, %c0_6] : memref<3x16xf32, #tpu.memory_space<vmem>>, vector<1x16xf32>
    %8 = arith.mulf %5, %5 : vector<128x16xf32>
    %9 = tpu.concatenate %5, %8 in 1 : vector<128x16xf32>, vector<128x16xf32> -> vector<128x32xf32>
    %10 = vector.extract_strided_slice %9 {offsets = [0, 0], sizes = [64, 32], strides = [1, 1]} : vector<128x32xf32> to vector<64x32xf32>
    %cst_7 = arith.constant dense<0.000000e+00> : vector<32xf32>
    %11 = vector.multi_reduction <add>, %10, %cst_7 [0] : vector<64x32xf32> to vector<32xf32>
    %12 = vector.shape_cast %11 : vector<32xf32> to vector<1x32xf32>
    %13 = vector.extract_strided_slice %9 {offsets = [64, 0], sizes = [64, 32], strides = [1, 1]} : vector<128x32xf32> to vector<64x32xf32>
    %cst_8 = arith.constant dense<0.000000e+00> : vector<32xf32>
    %14 = vector.multi_reduction <add>, %13, %cst_8 [0] : vector<64x32xf32> to vector<32xf32>
    %15 = vector.shape_cast %14 : vector<32xf32> to vector<1x32xf32>
    %16 = tpu.concatenate %12, %15 in 0 : vector<1x32xf32>, vector<1x32xf32> -> vector<2x32xf32>
    %17 = vector.extract_strided_slice %16 {offsets = [0, 0], sizes = [2, 16], strides = [1, 1]} : vector<2x32xf32> to vector<2x16xf32>
    %18 = vector.extract_strided_slice %16 {offsets = [0, 16], sizes = [2, 16], strides = [1, 1]} : vector<2x32xf32> to vector<2x16xf32>
    %cst_9 = arith.constant 1.562500e-02 : f32
    %19 = vector.broadcast %cst_9 : f32 to vector<2x16xf32>
    %20 = arith.mulf %17, %19 : vector<2x16xf32>
    %cst_10 = arith.constant 1.562500e-02 : f32
    %21 = vector.broadcast %cst_10 : f32 to vector<2x16xf32>
    %22 = arith.mulf %18, %21 : vector<2x16xf32>
    %23 = arith.mulf %20, %20 : vector<2x16xf32>
    %24 = arith.subf %22, %23 : vector<2x16xf32>
    %cst_11 = arith.constant 0.000000e+00 : f32
    %25 = vector.broadcast %cst_11 : f32 to vector<2x16xf32>
    %26 = arith.maximumf %24, %25 : vector<2x16xf32>
    %cst_12 = arith.constant 9.99999974E-6 : f32
    %27 = vector.broadcast %cst_12 : f32 to vector<2x16xf32>
    %28 = arith.addf %26, %27 : vector<2x16xf32>
    %29 = math.rsqrt %28 : vector<2x16xf32>
    %30 = vector.broadcast %6 : vector<1x16xf32> to vector<2x16xf32>
    %31 = arith.mulf %29, %30 : vector<2x16xf32>
    %32 = arith.mulf %20, %31 : vector<2x16xf32>
    %33 = vector.broadcast %7 : vector<1x16xf32> to vector<2x16xf32>
    %34 = arith.subf %33, %32 : vector<2x16xf32>
    %35 = vector.extract_strided_slice %5 {offsets = [0, 0], sizes = [64, 16], strides = [1, 1]} : vector<128x16xf32> to vector<64x16xf32>
    %36 = vector.extract_strided_slice %31 {offsets = [0, 0], sizes = [1, 16], strides = [1, 1]} : vector<2x16xf32> to vector<1x16xf32>
    %37 = vector.broadcast %36 : vector<1x16xf32> to vector<64x16xf32>
    %38 = arith.mulf %35, %37 : vector<64x16xf32>
    %39 = vector.extract_strided_slice %34 {offsets = [0, 0], sizes = [1, 16], strides = [1, 1]} : vector<2x16xf32> to vector<1x16xf32>
    %40 = vector.broadcast %39 : vector<1x16xf32> to vector<64x16xf32>
    %41 = arith.addf %38, %40 : vector<64x16xf32>
    %cst_13 = arith.constant 0.000000e+00 : f32
    %42 = vector.broadcast %cst_13 : f32 to vector<64x16xf32>
    %43 = arith.maximumf %41, %42 : vector<64x16xf32>
    %44 = vector.extract_strided_slice %5 {offsets = [64, 0], sizes = [64, 16], strides = [1, 1]} : vector<128x16xf32> to vector<64x16xf32>
    %45 = vector.extract_strided_slice %31 {offsets = [1, 0], sizes = [1, 16], strides = [1, 1]} : vector<2x16xf32> to vector<1x16xf32>
    %46 = vector.broadcast %45 : vector<1x16xf32> to vector<64x16xf32>
    %47 = arith.mulf %44, %46 : vector<64x16xf32>
    %48 = vector.extract_strided_slice %34 {offsets = [1, 0], sizes = [1, 16], strides = [1, 1]} : vector<2x16xf32> to vector<1x16xf32>
    %49 = vector.broadcast %48 : vector<1x16xf32> to vector<64x16xf32>
    %50 = arith.addf %47, %49 : vector<64x16xf32>
    %cst_14 = arith.constant 0.000000e+00 : f32
    %51 = vector.broadcast %cst_14 : f32 to vector<64x16xf32>
    %52 = arith.maximumf %50, %51 : vector<64x16xf32>
    %53 = tpu.concatenate %43, %52 in 0 : vector<64x16xf32>, vector<64x16xf32> -> vector<128x16xf32>
    %c127_i32 = arith.constant 127 : i32
    %54 = tpu.dynamic_rotate %53 by %c127_i32 dim 0 : vector<128x16xf32>, i32 -> vector<128x16xf32>
    %c120_i32 = arith.constant 120 : i32
    %55 = tpu.dynamic_rotate %53 by %c120_i32 dim 0 : vector<128x16xf32>, i32 -> vector<128x16xf32>
    %c119_i32 = arith.constant 119 : i32
    %56 = tpu.dynamic_rotate %53 by %c119_i32 dim 0 : vector<128x16xf32>, i32 -> vector<128x16xf32>
    %57 = tpu.concatenate %54, %55, %56 in 1 : vector<128x16xf32>, vector<128x16xf32>, vector<128x16xf32> -> vector<128x48xf32>
    %58 = arith.truncf %53 : vector<128x16xf32> to vector<128x16xbf16>
    %59 = arith.truncf %57 : vector<128x48xf32> to vector<128x48xbf16>
    %c0_15 = arith.constant 0 : index
    %c0_16 = arith.constant 0 : index
    %60 = vector.load %arg2[%c0_15, %c0_16] : memref<128x48xbf16, #tpu.memory_space<vmem>>, vector<128x48xbf16>
    %61 = arith.mulf %59, %60 : vector<128x48xbf16>
    %62 = tpu.concatenate %58, %61 in 1 : vector<128x16xbf16>, vector<128x48xbf16> -> vector<128x64xbf16>
    %c0_17 = arith.constant 0 : index
    %c0_18 = arith.constant 0 : index
    %63 = vector.load %arg5[%c0_17, %c0_18] : memref<64x64xbf16, #tpu.memory_space<vmem>>, vector<64x64xbf16>
    %cst_19 = arith.constant dense<0.000000e+00> : vector<128x64xf32>
    %64 = tpu.matmul %62, %63, %cst_19 {dimension_numbers = #tpu.dot_dimension_numbers<[1], [0], [0], [1], [0, 0, 1, 1], [], []>} : vector<128x64xbf16>, vector<64x64xbf16>, vector<128x64xf32> -> vector<128x64xf32>
    %c0_20 = arith.constant 0 : index
    %c0_21 = arith.constant 0 : index
    %65 = vector.load %arg6[%c0_20, %c0_21] : memref<3x64xf32, #tpu.memory_space<vmem>>, vector<1x64xf32>
    %66 = vector.broadcast %65 : vector<1x64xf32> to vector<128x64xf32>
    %67 = arith.addf %64, %66 : vector<128x64xf32>
    %c1_22 = arith.constant 1 : index
    %c0_23 = arith.constant 0 : index
    %68 = vector.load %arg6[%c1_22, %c0_23] : memref<3x64xf32, #tpu.memory_space<vmem>>, vector<1x64xf32>
    %c2_24 = arith.constant 2 : index
    %c0_25 = arith.constant 0 : index
    %69 = vector.load %arg6[%c2_24, %c0_25] : memref<3x64xf32, #tpu.memory_space<vmem>>, vector<1x64xf32>
    %70 = arith.mulf %67, %67 : vector<128x64xf32>
    %71 = tpu.concatenate %67, %70 in 1 : vector<128x64xf32>, vector<128x64xf32> -> vector<128x128xf32>
    %72 = vector.extract_strided_slice %71 {offsets = [0, 0], sizes = [64, 128], strides = [1, 1]} : vector<128x128xf32> to vector<64x128xf32>
    %cst_26 = arith.constant dense<0.000000e+00> : vector<128xf32>
    %73 = vector.multi_reduction <add>, %72, %cst_26 [0] : vector<64x128xf32> to vector<128xf32>
    %74 = vector.shape_cast %73 : vector<128xf32> to vector<1x128xf32>
    %75 = vector.extract_strided_slice %71 {offsets = [64, 0], sizes = [64, 128], strides = [1, 1]} : vector<128x128xf32> to vector<64x128xf32>
    %cst_27 = arith.constant dense<0.000000e+00> : vector<128xf32>
    %76 = vector.multi_reduction <add>, %75, %cst_27 [0] : vector<64x128xf32> to vector<128xf32>
    %77 = vector.shape_cast %76 : vector<128xf32> to vector<1x128xf32>
    %78 = tpu.concatenate %74, %77 in 0 : vector<1x128xf32>, vector<1x128xf32> -> vector<2x128xf32>
    %79 = vector.extract_strided_slice %78 {offsets = [0, 0], sizes = [2, 64], strides = [1, 1]} : vector<2x128xf32> to vector<2x64xf32>
    %80 = vector.extract_strided_slice %78 {offsets = [0, 64], sizes = [2, 64], strides = [1, 1]} : vector<2x128xf32> to vector<2x64xf32>
    %81 = tpu.concatenate %79, %80 in 0 : vector<2x64xf32>, vector<2x64xf32> -> vector<4x64xf32>
    %c0_28 = arith.constant 0 : index
    %c0_29 = arith.constant 0 : index
    %82 = vector.load %arg7[%c0_28, %c0_29] : memref<64x64xf32, #tpu.memory_space<vmem>>, vector<64x64xf32>
    %cst_30 = arith.constant dense<0.000000e+00> : vector<4x64xf32>
    %83 = tpu.matmul %81, %82, %cst_30 {dimension_numbers = #tpu.dot_dimension_numbers<[1], [0], [0], [1], [0, 0, 1, 1], [], []>} : vector<4x64xf32>, vector<64x64xf32>, vector<4x64xf32> -> vector<4x64xf32>
    %84 = vector.extract_strided_slice %83 {offsets = [0, 0], sizes = [2, 64], strides = [1, 1]} : vector<4x64xf32> to vector<2x64xf32>
    %85 = vector.extract_strided_slice %83 {offsets = [2, 0], sizes = [2, 64], strides = [1, 1]} : vector<4x64xf32> to vector<2x64xf32>
    %86 = arith.mulf %84, %84 : vector<2x64xf32>
    %87 = arith.subf %85, %86 : vector<2x64xf32>
    %cst_31 = arith.constant 0.000000e+00 : f32
    %88 = vector.broadcast %cst_31 : f32 to vector<2x64xf32>
    %89 = arith.maximumf %87, %88 : vector<2x64xf32>
    %cst_32 = arith.constant 9.99999974E-6 : f32
    %90 = vector.broadcast %cst_32 : f32 to vector<2x64xf32>
    %91 = arith.addf %89, %90 : vector<2x64xf32>
    %92 = math.rsqrt %91 : vector<2x64xf32>
    %93 = vector.broadcast %68 : vector<1x64xf32> to vector<2x64xf32>
    %94 = arith.mulf %92, %93 : vector<2x64xf32>
    %95 = arith.mulf %84, %94 : vector<2x64xf32>
    %96 = vector.broadcast %69 : vector<1x64xf32> to vector<2x64xf32>
    %97 = arith.subf %96, %95 : vector<2x64xf32>
    %98 = vector.extract_strided_slice %67 {offsets = [0, 0], sizes = [64, 64], strides = [1, 1]} : vector<128x64xf32> to vector<64x64xf32>
    %99 = vector.extract_strided_slice %94 {offsets = [0, 0], sizes = [1, 64], strides = [1, 1]} : vector<2x64xf32> to vector<1x64xf32>
    %100 = vector.broadcast %99 : vector<1x64xf32> to vector<64x64xf32>
    %101 = arith.mulf %98, %100 : vector<64x64xf32>
    %102 = vector.extract_strided_slice %97 {offsets = [0, 0], sizes = [1, 64], strides = [1, 1]} : vector<2x64xf32> to vector<1x64xf32>
    %103 = vector.broadcast %102 : vector<1x64xf32> to vector<64x64xf32>
    %104 = arith.addf %101, %103 : vector<64x64xf32>
    %cst_33 = arith.constant 0.000000e+00 : f32
    %105 = vector.broadcast %cst_33 : f32 to vector<64x64xf32>
    %106 = arith.maximumf %104, %105 : vector<64x64xf32>
    %107 = vector.extract_strided_slice %67 {offsets = [64, 0], sizes = [64, 64], strides = [1, 1]} : vector<128x64xf32> to vector<64x64xf32>
    %108 = vector.extract_strided_slice %94 {offsets = [1, 0], sizes = [1, 64], strides = [1, 1]} : vector<2x64xf32> to vector<1x64xf32>
    %109 = vector.broadcast %108 : vector<1x64xf32> to vector<64x64xf32>
    %110 = arith.mulf %107, %109 : vector<64x64xf32>
    %111 = vector.extract_strided_slice %97 {offsets = [1, 0], sizes = [1, 64], strides = [1, 1]} : vector<2x64xf32> to vector<1x64xf32>
    %112 = vector.broadcast %111 : vector<1x64xf32> to vector<64x64xf32>
    %113 = arith.addf %110, %112 : vector<64x64xf32>
    %cst_34 = arith.constant 0.000000e+00 : f32
    %114 = vector.broadcast %cst_34 : f32 to vector<64x64xf32>
    %115 = arith.maximumf %113, %114 : vector<64x64xf32>
    %116 = tpu.concatenate %106, %115 in 0 : vector<64x64xf32>, vector<64x64xf32> -> vector<128x64xf32>
    %117 = arith.truncf %116 : vector<128x64xf32> to vector<128x64xbf16>
    %c0_35 = arith.constant 0 : index
    %c0_36 = arith.constant 0 : index
    %118 = vector.load %arg8[%c0_35, %c0_36] : memref<64x128xbf16, #tpu.memory_space<vmem>>, vector<64x128xbf16>
    %cst_37 = arith.constant dense<0.000000e+00> : vector<128x128xf32>
    %119 = tpu.matmul %117, %118, %cst_37 {dimension_numbers = #tpu.dot_dimension_numbers<[1], [0], [0], [1], [0, 0, 1, 1], [], []>} : vector<128x64xbf16>, vector<64x128xbf16>, vector<128x128xf32> -> vector<128x128xf32>
    %c0_38 = arith.constant 0 : index
    %c0_39 = arith.constant 0 : index
    %120 = vector.load %arg9[%c0_38, %c0_39] : memref<3x128xf32, #tpu.memory_space<vmem>>, vector<1x128xf32>
    %121 = vector.broadcast %120 : vector<1x128xf32> to vector<128x128xf32>
    %122 = arith.addf %119, %121 : vector<128x128xf32>
    %c1_40 = arith.constant 1 : index
    %c0_41 = arith.constant 0 : index
    %123 = vector.load %arg9[%c1_40, %c0_41] : memref<3x128xf32, #tpu.memory_space<vmem>>, vector<1x128xf32>
    %c2_42 = arith.constant 2 : index
    %c0_43 = arith.constant 0 : index
    %124 = vector.load %arg9[%c2_42, %c0_43] : memref<3x128xf32, #tpu.memory_space<vmem>>, vector<1x128xf32>
    %125 = arith.mulf %122, %122 : vector<128x128xf32>
    %126 = vector.extract_strided_slice %122 {offsets = [0, 0], sizes = [64, 128], strides = [1, 1]} : vector<128x128xf32> to vector<64x128xf32>
    %cst_44 = arith.constant dense<0.000000e+00> : vector<128xf32>
    %127 = vector.multi_reduction <add>, %126, %cst_44 [0] : vector<64x128xf32> to vector<128xf32>
    %128 = vector.shape_cast %127 : vector<128xf32> to vector<1x128xf32>
    %129 = vector.extract_strided_slice %122 {offsets = [64, 0], sizes = [64, 128], strides = [1, 1]} : vector<128x128xf32> to vector<64x128xf32>
    %cst_45 = arith.constant dense<0.000000e+00> : vector<128xf32>
    %130 = vector.multi_reduction <add>, %129, %cst_45 [0] : vector<64x128xf32> to vector<128xf32>
    %131 = vector.shape_cast %130 : vector<128xf32> to vector<1x128xf32>
    %132 = tpu.concatenate %128, %131 in 0 : vector<1x128xf32>, vector<1x128xf32> -> vector<2x128xf32>
    %133 = vector.extract_strided_slice %125 {offsets = [0, 0], sizes = [64, 128], strides = [1, 1]} : vector<128x128xf32> to vector<64x128xf32>
    %cst_46 = arith.constant dense<0.000000e+00> : vector<128xf32>
    %134 = vector.multi_reduction <add>, %133, %cst_46 [0] : vector<64x128xf32> to vector<128xf32>
    %135 = vector.shape_cast %134 : vector<128xf32> to vector<1x128xf32>
    %136 = vector.extract_strided_slice %125 {offsets = [64, 0], sizes = [64, 128], strides = [1, 1]} : vector<128x128xf32> to vector<64x128xf32>
    %cst_47 = arith.constant dense<0.000000e+00> : vector<128xf32>
    %137 = vector.multi_reduction <add>, %136, %cst_47 [0] : vector<64x128xf32> to vector<128xf32>
    %138 = vector.shape_cast %137 : vector<128xf32> to vector<1x128xf32>
    %139 = tpu.concatenate %135, %138 in 0 : vector<1x128xf32>, vector<1x128xf32> -> vector<2x128xf32>
    %140 = tpu.concatenate %132, %139 in 0 : vector<2x128xf32>, vector<2x128xf32> -> vector<4x128xf32>
    %c0_48 = arith.constant 0 : index
    %c0_49 = arith.constant 0 : index
    %141 = vector.load %arg10[%c0_48, %c0_49] : memref<128x128xf32, #tpu.memory_space<vmem>>, vector<128x128xf32>
    %cst_50 = arith.constant dense<0.000000e+00> : vector<4x128xf32>
    %142 = tpu.matmul %140, %141, %cst_50 {dimension_numbers = #tpu.dot_dimension_numbers<[1], [0], [0], [1], [0, 0, 1, 1], [], []>} : vector<4x128xf32>, vector<128x128xf32>, vector<4x128xf32> -> vector<4x128xf32>
    %143 = vector.extract_strided_slice %142 {offsets = [0, 0], sizes = [2, 128], strides = [1, 1]} : vector<4x128xf32> to vector<2x128xf32>
    %144 = vector.extract_strided_slice %142 {offsets = [2, 0], sizes = [2, 128], strides = [1, 1]} : vector<4x128xf32> to vector<2x128xf32>
    %145 = arith.mulf %143, %143 : vector<2x128xf32>
    %146 = arith.subf %144, %145 : vector<2x128xf32>
    %cst_51 = arith.constant 0.000000e+00 : f32
    %147 = vector.broadcast %cst_51 : f32 to vector<2x128xf32>
    %148 = arith.maximumf %146, %147 : vector<2x128xf32>
    %cst_52 = arith.constant 9.99999974E-6 : f32
    %149 = vector.broadcast %cst_52 : f32 to vector<2x128xf32>
    %150 = arith.addf %148, %149 : vector<2x128xf32>
    %151 = math.rsqrt %150 : vector<2x128xf32>
    %152 = vector.broadcast %123 : vector<1x128xf32> to vector<2x128xf32>
    %153 = arith.mulf %151, %152 : vector<2x128xf32>
    %154 = arith.mulf %143, %153 : vector<2x128xf32>
    %155 = vector.broadcast %124 : vector<1x128xf32> to vector<2x128xf32>
    %156 = arith.subf %155, %154 : vector<2x128xf32>
    %157 = vector.extract_strided_slice %122 {offsets = [0, 0], sizes = [64, 128], strides = [1, 1]} : vector<128x128xf32> to vector<64x128xf32>
    %158 = vector.extract_strided_slice %153 {offsets = [0, 0], sizes = [1, 128], strides = [1, 1]} : vector<2x128xf32> to vector<1x128xf32>
    %159 = vector.broadcast %158 : vector<1x128xf32> to vector<64x128xf32>
    %160 = arith.mulf %157, %159 : vector<64x128xf32>
    %161 = vector.extract_strided_slice %156 {offsets = [0, 0], sizes = [1, 128], strides = [1, 1]} : vector<2x128xf32> to vector<1x128xf32>
    %162 = vector.broadcast %161 : vector<1x128xf32> to vector<64x128xf32>
    %163 = arith.addf %160, %162 : vector<64x128xf32>
    %cst_53 = arith.constant 0.000000e+00 : f32
    %164 = vector.broadcast %cst_53 : f32 to vector<64x128xf32>
    %165 = arith.maximumf %163, %164 : vector<64x128xf32>
    %166 = vector.extract_strided_slice %122 {offsets = [64, 0], sizes = [64, 128], strides = [1, 1]} : vector<128x128xf32> to vector<64x128xf32>
    %167 = vector.extract_strided_slice %153 {offsets = [1, 0], sizes = [1, 128], strides = [1, 1]} : vector<2x128xf32> to vector<1x128xf32>
    %168 = vector.broadcast %167 : vector<1x128xf32> to vector<64x128xf32>
    %169 = arith.mulf %166, %168 : vector<64x128xf32>
    %170 = vector.extract_strided_slice %156 {offsets = [1, 0], sizes = [1, 128], strides = [1, 1]} : vector<2x128xf32> to vector<1x128xf32>
    %171 = vector.broadcast %170 : vector<1x128xf32> to vector<64x128xf32>
    %172 = arith.addf %169, %171 : vector<64x128xf32>
    %cst_54 = arith.constant 0.000000e+00 : f32
    %173 = vector.broadcast %cst_54 : f32 to vector<64x128xf32>
    %174 = arith.maximumf %172, %173 : vector<64x128xf32>
    %175 = tpu.concatenate %165, %174 in 0 : vector<64x128xf32>, vector<64x128xf32> -> vector<128x128xf32>
    %176 = arith.truncf %175 : vector<128x128xf32> to vector<128x128xbf16>
    %c0_55 = arith.constant 0 : index
    %c0_56 = arith.constant 0 : index
    %177 = vector.load %arg11[%c0_55, %c0_56] : memref<128x128xbf16, #tpu.memory_space<vmem>>, vector<128x128xbf16>
    tpu.vector_store %arg11[%c0_55, %c0_56], %176 {strides = array<i32>} : memref<128x128xbf16, #tpu.memory_space<vmem>>, vector<128x128xbf16>,
    return
  }
  func.func @transform_0(%arg0: i32) -> (i32, i32) {
    %c0_i32 = arith.constant 0 : i32
    %c0_i32_0 = arith.constant 0 : i32
    return %arg0, %c0_i32 : i32, i32
  }
  func.func @transform_1(%arg0: i32) -> (i32, i32) {
    %c0_i32 = arith.constant 0 : i32
    %c0_i32_0 = arith.constant 0 : i32
    %c0_i32_1 = arith.constant 0 : i32
    return %c0_i32, %c0_i32_0 : i32, i32
  }
  func.func @transform_2(%arg0: i32) -> (i32, i32) {
    %c0_i32 = arith.constant 0 : i32
    %c0_i32_0 = arith.constant 0 : i32
    %c0_i32_1 = arith.constant 0 : i32
    return %c0_i32, %c0_i32_0 : i32, i32
  }
  func.func @transform_3(%arg0: i32) -> (i32, i32) {
    %c0_i32 = arith.constant 0 : i32
    %c0_i32_0 = arith.constant 0 : i32
    %c0_i32_1 = arith.constant 0 : i32
    return %c0_i32, %c0_i32_0 : i32, i32
  }
  func.func @transform_4(%arg0: i32) -> (i32, i32) {
    %c0_i32 = arith.constant 0 : i32
    %c0_i32_0 = arith.constant 0 : i32
    %c0_i32_1 = arith.constant 0 : i32
    return %c0_i32, %c0_i32_0 : i32, i32
  }
  func.func @transform_5(%arg0: i32) -> (i32, i32) {
    %c0_i32 = arith.constant 0 : i32
    %c0_i32_0 = arith.constant 0 : i32
    %c0_i32_1 = arith.constant 0 : i32
    return %c0_i32, %c0_i32_0 : i32, i32
  }
  func.func @transform_6(%arg0: i32) -> (i32, i32) {
    %c0_i32 = arith.constant 0 : i32
    %c0_i32_0 = arith.constant 0 : i32
    %c0_i32_1 = arith.constant 0 : i32
    return %c0_i32, %c0_i32_0 : i32, i32
  }
  func.func @transform_7(%arg0: i32) -> (i32, i32) {
    %c0_i32 = arith.constant 0 : i32
    %c0_i32_0 = arith.constant 0 : i32
    %c0_i32_1 = arith.constant 0 : i32
    return %c0_i32, %c0_i32_0 : i32, i32
  }
  func.func @transform_8(%arg0: i32) -> (i32, i32) {
    %c0_i32 = arith.constant 0 : i32
    %c0_i32_0 = arith.constant 0 : i32
    %c0_i32_1 = arith.constant 0 : i32
    return %c0_i32, %c0_i32_0 : i32, i32
  }
  func.func @transform_9(%arg0: i32) -> (i32, i32) {
    %c0_i32 = arith.constant 0 : i32
    %c0_i32_0 = arith.constant 0 : i32
    %c0_i32_1 = arith.constant 0 : i32
    return %c0_i32, %c0_i32_0 : i32, i32
  }
  func.func @transform_10(%arg0: i32) -> (i32, i32) {
    %c0_i32 = arith.constant 0 : i32
    %c0_i32_0 = arith.constant 0 : i32
    return %arg0, %c0_i32 : i32, i32
  }
}

</mosaic_0001>

<bundles_post_ra>
// kernel: decoder_block.1
= control target key start
LH: loop header
LB: loop body
LE: loop exit
PB: predicated region body
PF: predicated region fallthrough
CT: control target
= control target key end

     0   :  { %vm129_vm0 = vcmask 523264   ;;  %s2223_s18 = smov 16   ;;  %vm333_vm1 = vcmask 130048   ;;  %vm350_vm2 = vcmask 261120   ;;  %vm393_vm3 = vcmask 1040384   ;;  %s2224_s20 = smov 112   ;;  %s3268_s2 = inlined_call_operand.vmem [shape: bf16[64,16], index: 2, kind: input, shape index: {}]   ;;  %s3269_s0 = inlined_call_operand.vmem [shape: bf16[128,64], index: 0, kind: input, shape index: {}]   ;;  %s3270_s3 = inlined_call_operand.vmem [shape: f32[3,16], index: 3, kind: input, shape index: {}]   ;;  %s3271_s1 = inlined_call_operand.vmem [shape: bf16[128,48], index: 1, kind: input, shape index: {}]   ;;  %s3272_s4 = inlined_call_operand.vmem [shape: bf16[64,64], index: 4, kind: input, shape index: {}]   ;;  %s3273_s5 = inlined_call_operand.vmem [shape: f32[3,64], index: 5, kind: input, shape index: {}]   ;;  %s3274_s6 = inlined_call_operand.vmem [shape: f32[64,64], index: 6, kind: input, shape index: {}]   ;;  %s3275_s7 = inlined_call_operand.vmem [shape: bf16[64,128], index: 7, kind: input, shape index: {}]   ;;  %s3276_s9 = inlined_call_operand.vmem [shape: f32[128,128], index: 9, kind: input, shape index: {}]   ;;  %s3277_s8 = inlined_call_operand.vmem [shape: f32[3,128], index: 8, kind: input, shape index: {}]   ;;  %s3278_s10 = inlined_call_operand.vmem [shape: bf16[128,128], index: 10, kind: output, shape index: {}]  }
   0x1   :  { %v2189_v0 = vld [vmem:[%s3268_s2 + $0x18] sm:$0xff]   ;;  %v2190_v1 = vld [vmem:[%s3268_s2 + $0x10] sm:$0xff]   ;;  %v2191_v2 = vld [vmem:[%s3268_s2 + $0x8] sm:$0xff]   ;;  %s2226_s24 = smov 64   ;;  %vm2228_vm5 = vmmov 0   ;;  %vm1107_vm6 = vcmask 1041408  }
   0x2   :  { %1977 = vmatprep.subr.bf16.mxu0 %v2189_v0  ;;  %v2193_v3 = vld [vmem:[%s3269_s0] sm:$0xff]   ;;  %v2194_v5 = vld [vmem:[%s3269_s0 + $0x8] sm:$0xff]   ;;  %v2195_v6 = vld [vmem:[%s3269_s0 + $0x10] sm:$0xff]  }
   0x3   :  { %1978 = vmatpush3.bf16.msra.mxu0 %v2189_v0  ;;  %1985 = vmatprep.mubr.msk.bf16.mxu0 %vm129_vm0, %v2193_v3  ;;  %v2192_v4 = vld [vmem:[%s3268_s2] sm:$0xff]   ;;  %v2196_v7 = vld [vmem:[%s3269_s0 + $0x18] sm:$0xff]   ;;  %v2198_v9 = vld [vmem:[%s3269_s0 + $0x28] sm:$0xff]  }
   0x4   :  { %1979 = vmatprep.subr.bf16.mxu0 %v2190_v1  ;;  %v2197_v8 = vld [vmem:[%s3269_s0 + $0x20] sm:$0xff]   ;;  %v2199_v10 = vld [vmem:[%s3269_s0 + $0x30] sm:$0xff]   ;;  %v2200_v11 = vld [vmem:[%s3269_s0 + $0x38] sm:$0xff]  }
   0x5   :  { %v1774_v12 = vld [vmem:[%s3270_s3] ss:$0 sm:$0xff]  ;;  %v1795_v61 = vld [vmem:[%s3270_s3 + $0x1] ss:$0 sm:$0xff] }
   0x7   :  { %1980 = vmatpush3.bf16.msra.mxu0 %v2190_v1 }
   0x8   :  { %1981 = vmatprep.subr.bf16.mxu0 %v2191_v2 }
   0xb   :  { %1982 = vmatpush3.bf16.msra.mxu0 %v2191_v2 }
   0xc   :  { %1983 = vmatprep.subr.bf16.mxu0 %v2192_v4 }
   0xf   :  { %1984 = vmatpush3.bf16.msra.mxu0 %v2192_v4 }
  0x12   :  { %1986 = vmatmul.mubr.msk.bf16.vlgmr.msra.gmra.mxu0 %vm129_vm0, %v2194_v5 }
  0x13   :  { %1989 = vmatprep.mubr.msk.bf16.mxu0 %vm129_vm0, %v2195_v6 }
  0x1a   :  { %1990 = vmatmul.mubr.msk.bf16.gmra.mxu0 %vm129_vm0, %v2196_v7 }
  0x1b   :  { %1993 = vmatprep.mubr.msk.bf16.mxu0 %vm129_vm0, %v2197_v8 }
  0x22   :  { %1994 = vmatmul.mubr.msk.bf16.gmra.mxu0 %vm129_vm0, %v2198_v9 }
  0x23   :  { %1997 = vmatprep.mubr.msk.bf16.mxu0 %vm129_vm0, %v2199_v10 }
  0x2a   :  { %1998 = vmatmul.mubr.msk.bf16.gmra.mxu0 %vm129_vm0, %v2200_v11 }
  0xd2   :  { %v1987_v13 = vpop.f32.mrf.mxu0 }
  0xd3   :  { %v2331_v14 = vadd.f32 %v1987_v13, %v1774_v12 }
  0xd4   :  { %v188_v15 = vpop.f32.mrf.mxu0 }
  0xd5   :  { %v2333_v16 = vadd.f32 %v1774_v12, %v188_v15  ;;  %v255_v17 = vmul.f32 %v2331_v14, %v2331_v14 }
  0xd6   :  { %v1988_v18 = vpop.f32.mrf.mxu0 }
  0xd7   :  { %289 = vrot.lane.b32.xlu0 %v255_v17, %s2223_s18  ;;  %v2338_v20 = vadd.f32 %v1988_v18, %v1774_v12  ;;  %v253_v21 = vmul.f32 %v2333_v16, %v2333_v16 }
  0xd8   :  { %v191_v19 = vpop.f32.mrf.mxu0 }
  0xd9   :  { %v2343_v24 = vadd.f32 %v1774_v12, %v191_v19  ;;  %v256_v25 = vmul.f32 %v2338_v20, %v2338_v20 }
  0xda   :  { %v1991_v22 = vpop.f32.mrf.mxu0 }
  0xdb   :  { %285 = vrot.lane.b32.xlu0 %v253_v21, %s2223_s18  ;;  %v2348_v28 = vadd.f32 %v1991_v22, %v1774_v12  ;;  %v254_v29 = vmul.f32 %v2343_v24, %v2343_v24 }
  0xdc   :  { %v204_v23 = vpop.f32.mrf.mxu0 }
  0xdd   :  { %v2355_v33 = vadd.f32 %v1774_v12, %v204_v23  ;;  %v259_v36 = vmul.f32 %v2348_v28, %v2348_v28 }
  0xde   :  { %v1992_v26 = vpop.f32.mrf.mxu0 }
  0xdf   :  { %291 = vrot.lane.b32.xlu0 %v256_v25, %s2223_s18  ;;  %v257_v42 = vmul.f32 %v2355_v33, %v2355_v33  ;;  %v2375_v44 = vadd.f32 %v1992_v26, %v1774_v12 }
  0xe0   :  { %v207_v27 = vpop.f32.mrf.mxu0 }
  0xe1   :  { %v2365_v39 = vadd.f32 %v1774_v12, %v207_v27  ;;  %v260_v51 = vmul.f32 %v2375_v44, %v2375_v44 }
  0xe2   :  { %v1995_v30 = vpop.f32.mrf.mxu0 }
  0xe3   :  { %v2352_v31 = vadd.f32 %v1995_v30, %v1774_v12  ;;  %287 = vrot.lane.b32.xlu0 %v254_v29, %s2223_s18  ;;  %v258_v47 = vmul.f32 %v2365_v39, %v2365_v39 }
  0xe4   :  { %v220_v32 = vpop.f32.mrf.mxu0 }
  0xe5   :  { %v2357_v34 = vadd.f32 %v1774_v12, %v220_v32  ;;  %v263_v35 = vmul.f32 %v2352_v31, %v2352_v31 }
  0xe6   :  { %v1996_v37 = vpop.f32.mrf.mxu0 }
  0xe7   :  { %305 = vrot.lane.b32.xlu1 %v263_v35, %s2223_s18  ;;  %297 = vrot.lane.b32.xlu0 %v259_v36, %s2223_s18  ;;  %v2367_v40 = vadd.f32 %v1996_v37, %v1774_v12  ;;  %v261_v41 = vmul.f32 %v2357_v34, %v2357_v34 }
  0xe8   :  { %v223_v38 = vpop.f32.mrf.mxu0 }
  0xe9   :  { %v2377_v45 = vadd.f32 %v1774_v12, %v223_v38  ;;  %v264_v46 = vmul.f32 %v2367_v40, %v2367_v40 }
  0xea   :  { %v1999_v43 = vpop.f32.mrf.mxu0 }
  0xeb   :  { %301 = vrot.lane.b32.xlu1 %v261_v41, %s2223_s18  ;;  %293 = vrot.lane.b32.xlu0 %v257_v42, %s2223_s18  ;;  %v2383_v49 = vadd.f32 %v1999_v43, %v1774_v12  ;;  %v262_v50 = vmul.f32 %v2377_v45, %v2377_v45 }
  0xec   :  { %v236_v48 = vpop.f32.mrf.mxu0 }
  0xed   :  { %v267_v53 = vmul.f32 %v2383_v49, %v2383_v49  ;;  %v2395_v54 = vadd.f32 %v1774_v12, %v236_v48 }
  0xee   :  { %v2000_v52 = vpop.f32.mrf.mxu0 }
  0xef   :  { %307 = vrot.lane.b32.xlu1 %v264_v46, %s2223_s18  ;;  %295 = vrot.lane.b32.xlu0 %v258_v47, %s2223_s18  ;;  %v265_v57 = vmul.f32 %v2395_v54, %v2395_v54  ;;  %v2403_v58 = vadd.f32 %v2000_v52, %v1774_v12 }
  0xf0   :  { %v239_v55 = vpop.f32.mrf.mxu0 }
  0xf1   :  { %v2398_v56 = vadd.f32 %v1774_v12, %v239_v55  ;;  %v268_v60 = vmul.f32 %v2403_v58, %v2403_v58 }
  0xf3   :  { %303 = vrot.lane.b32.xlu1 %v262_v50, %s2223_s18  ;;  %299 = vrot.lane.b32.xlu0 %v260_v51, %s2223_s18  ;;  %v266_v59 = vmul.f32 %v2398_v56, %v2398_v56 }
  0xf7   :  { %313 = vrot.lane.b32.xlu1 %v267_v53, %s2223_s18 }
  0xfb   :  { %309 = vrot.lane.b32.xlu1 %v265_v57, %s2223_s18 }
  0xff   :  { %311 = vrot.lane.b32.xlu1 %v266_v59, %s2223_s18 }
 0x103   :  { %315 = vrot.lane.b32.xlu1 %v268_v60, %s2223_s18 }
 0x107   :  { %410 = vrot.lane.b32.xlu1 %v1795_v61, %s2223_s18 }
 0x149   :  { %v290_v62 = vpop.permute.xlu0 %289 }
 0x14a   :  { %v336_v6 = vsel %vm333_vm1, %v2331_v14, %v290_v62 }
 0x14b   :  { %v354_v10 = vsel %vm350_vm2, %v336_v6, 0.0 }
 0x14d   :  { %v286_v63 = vpop.permute.xlu0 %285 }
 0x14e   :  { %v334_v1 = vsel %vm333_vm1, %v2333_v16, %v286_v63 }
 0x14f   :  { %v351_v4 = vsel %vm350_vm2, %v334_v1, 0.0 }
 0x151   :  { %v292_v0 = vpop.permute.xlu0 %291 }
 0x152   :  { %v337_v11 = vsel %vm333_vm1, %v2338_v20, %v292_v0 }
 0x153   :  { %v356_v18 = vsel %vm350_vm2, %v337_v11, 0.0 }
 0x155   :  { %v288_v2 = vpop.permute.xlu0 %287 }
 0x156   :  { %v335_v3 = vsel %vm333_vm1, %v2343_v24, %v288_v2 }
 0x157   :  { %v352_v5 = vsel %vm350_vm2, %v335_v3, 0.0 }
 0x158   :  { %v353_v7 = vadd.f32 %v352_v5, %v351_v4 }
 0x159   :  { %v306_v8 = vpop.permute.xlu1 %305  ;;  %v298_v9 = vpop.permute.xlu0 %297 }
 0x15a   :  { %v355_v12 = vadd.f32 %v354_v10, %v353_v7  ;;  %v340_v29 = vsel %vm333_vm1, %v2348_v28, %v298_v9  ;;  %v344_v46 = vsel %vm333_vm1, %v2352_v31, %v306_v8 }
 0x15b   :  { %v362_v41 = vsel %vm350_vm2, %v340_v29, 0.0  ;;  %v375_v52 = vsel %vm350_vm2, %v344_v46, 0.0 }
 0x15c   :  { %v357_v21 = vadd.f32 %v356_v18, %v355_v12 }
 0x15d   :  { %v302_v13 = vpop.permute.xlu1 %301  ;;  %v294_v15 = vpop.permute.xlu0 %293 }
 0x15e   :  { %v338_v17 = vsel %vm333_vm1, %v2355_v33, %v294_v15  ;;  %v342_v30 = vsel %vm333_vm1, %v2357_v34, %v302_v13 }
 0x15f   :  { %v358_v19 = vsel %vm350_vm2, %v338_v17, 0.0  ;;  %v372_v42 = vsel %vm350_vm2, %v342_v30, 0.0 }
 0x160   :  { %v359_v25 = vadd.f32 %v358_v19, %v357_v21 }
 0x161   :  { %v308_v22 = vpop.permute.xlu1 %307  ;;  %v296_v23 = vpop.permute.xlu0 %295 }
 0x162   :  { %v339_v26 = vsel %vm333_vm1, %v2365_v39, %v296_v23  ;;  %v345_v53 = vsel %vm333_vm1, %v2367_v40, %v308_v22 }
 0x163   :  { %v360_v27 = vsel %vm350_vm2, %v339_v26, 0.0  ;;  %v377_v61 = vsel %vm350_vm2, %v345_v53, 0.0  ;;  %v1796_v53 = vld [vmem:[%s3270_s3 + $0x2] ss:$0 sm:$0xff]  ;;  %s2225_s3 = smov 32  }
 0x164   :  { %v361_v32 = vadd.f32 %v360_v27, %v359_v25 }
 0x165   :  { %v304_v35 = vpop.permute.xlu1 %303  ;;  %v300_v36 = vpop.permute.xlu0 %299 }
 0x166   :  { %v343_v37 = vsel %vm333_vm1, %v2377_v45, %v304_v35  ;;  %v341_v38 = vsel %vm333_vm1, %v2375_v44, %v300_v36  ;;  %v363_v48 = vadd.f32 %v362_v41, %v361_v32  ;;  %v424_v41 = vlaneseq }
 0x167   :  { %v373_v43 = vsel %vm350_vm2, %v343_v37, 0.0  ;;  %v364_v50 = vsel %vm350_vm2, %v341_v38, 0.0 }
 0x168   :  { %v374_v47 = vadd.f32 %v373_v43, %v372_v42  ;;  %v365_v57 = vadd.f32 %v364_v50, %v363_v48  ;;  %v2465_v42 = vshrl.u32 %v424_v41, 7 }
 0x169   :  { %v314_v51 = vpop.permute.xlu1 %313 }
 0x16a   :  { %v376_v55 = vadd.f32 %v375_v52, %v374_v47  ;;  %v366_v63 = vrot.slane %v365_v57, 4  ;;  %v348_v2 = vsel %vm333_vm1, %v2383_v49, %v314_v51  ;;  %v2468_v46 = vsub.s32 0, %v2465_v42 }
 0x16b   :  { %v383_v8 = vsel %vm350_vm2, %v348_v2, 0.0  ;;  %v2471_v50 = vsub.s32 1, %v2465_v42  ;;  %vm514_vm4 = vcmp.lt.s32.totalorder %v2465_v42, 7 }
 0x16c   :  { %v378_v0 = vadd.f32 %v377_v61, %v376_v55  ;;  %v367_v6 = vadd.f32 %v366_v63, %v365_v57 }
 0x16d   :  { %v310_v59 = vpop.permute.xlu1 %309 }
 0x16e   :  { %v346_v60 = vsel %vm333_vm1, %v2395_v54, %v310_v59  ;;  %v368_v13 = vrot.slane %v367_v6, 2 }
 0x16f   :  { %v379_v62 = vsel %vm350_vm2, %v346_v60, 0.0 }
 0x170   :  { %v380_v3 = vadd.f32 %v379_v62, %v378_v0  ;;  %v369_v18 = vadd.f32 %v368_v13, %v367_v6 }
 0x171   :  { %v312_v1 = vpop.permute.xlu1 %311 }
 0x172   :  { %v347_v4 = vsel %vm333_vm1, %v2398_v56, %v312_v1  ;;  %v370_v22 = vrot.slane %v369_v18, 1 }
 0x173   :  { %v381_v5 = vsel %vm350_vm2, %v347_v4, 0.0 }
 0x174   :  { %v382_v7 = vadd.f32 %v381_v5, %v380_v3  ;;  %v371_v26 = vadd.f32 %v370_v22, %v369_v18 }
 0x175   :  { %v316_v9 = vpop.permute.xlu1 %315 }
 0x176   :  { %v384_v10 = vadd.f32 %v383_v8, %v382_v7  ;;  %v349_v11 = vsel %vm333_vm1, %v2403_v58, %v316_v9 }
 0x177   :  { %v385_v12 = vsel %vm350_vm2, %v349_v11, 0.0 }
 0x178   :  { %v386_v15 = vadd.f32 %v385_v12, %v384_v10 }
 0x179   :  { %v411_v43 = vpop.permute.xlu1 %410 }
 0x17a   :  { %v387_v17 = vrot.slane %v386_v15, 4 }
 0x17c   :  { %v388_v19 = vadd.f32 %v387_v17, %v386_v15 }
 0x17e   :  { %v389_v21 = vrot.slane %v388_v19, 2 }
 0x180   :  { %v390_v23 = vadd.f32 %v389_v21, %v388_v19 }
 0x182   :  { %v391_v25 = vrot.slane %v390_v23, 1 }
 0x184   :  { %v392_v27 = vadd.f32 %v391_v25, %v390_v23 }
 0x186   :  { %v394_v29 = vsel %vm393_vm3, %v371_v26, %v392_v27 }
 0x187   :  { %v395_v30 = vmul.f32 0.015625, %v394_v29 }
 0x189   :  { %v396_v32 = vmul.f32 %v395_v30, %v395_v30 }
 0x18b   :  { %398 = vrot.lane.b32.xlu0 %v396_v32, %s2223_s18 }
 0x1fd   :  { %v399_v35 = vpop.permute.xlu0 %398 }
 0x1fe   :  { %v401_v36 = vsub.f32 %v395_v30, %v399_v35 }
 0x200   :  { %v402_v37 = vmax.f32 %v401_v36, 0.0 }
 0x202   :  { %v403_v38 = vadd.f32 1e-05, %v402_v37 }
 0x204   :  { %2217 = vrsqrt.f32 %v403_v38 }
 0x211   :  { %v2218_v47 = vpop.eup %2217 }
 0x212   :  { %v413_v48 = vmul.f32 %v2218_v47, %v411_v43 }
 0x214   :  { %415 = vrot.lane.b32.xlu0 %v413_v48, %s2224_s20  ;;  %v427_v51 = vrot.slane %v413_v48, %v2468_v46  ;;  %v463_v52 = vrot.slane %v413_v48, %v2471_v50 }
 0x216   :  { %429 = vrot.lane.b32.xlu1 %v427_v51, %s2224_s20 }
 0x218   :  { %465 = vrot.lane.b32.xlu0 %v463_v52, %s2224_s20 }
 0x286   :  { %v416_v55 = vpop.permute.xlu0 %415 }
 0x287   :  { %v418_v57 = vmul.f32 %v416_v55, %v395_v30 }
 0x288   :  { %v2478_v59 = vpop.permute.xlu1 %429 }
 0x289   :  { %v423_v60 = vsub.f32 %v1796_v53, %v418_v57  ;;  %v435_v61 = vmul.f32 %v2478_v59, %v2338_v20  ;;  %v436_v63 = vmul.f32 %v2478_v59, %v2355_v33  ;;  %v433_v0 = vmul.f32 %v2478_v59, %v2343_v24 }
 0x28a   :  { %v2483_v62 = vpop.permute.xlu0 %465  ;;  %v434_v1 = vmul.f32 %v2478_v59, %v2331_v14  ;;  %v437_v2 = vmul.f32 %v2478_v59, %v2365_v39  ;;  %v439_v20 = vmul.f32 %v2478_v59, %v2375_v44  ;;  %v438_v24 = vmul.f32 %v2478_v59, %v2348_v28 }
 0x28b   :  { %v2494_v3 = vrot.slane %v423_v60, %v2468_v46  ;;  %v2497_v4 = vrot.slane %v423_v60, %v2471_v50  ;;  %v468_v33 = vmul.f32 %v2483_v62, %v2357_v34  ;;  %v469_v14 = vmul.f32 %v2483_v62, %v2377_v45 }
 0x28c   :  { %v471_v39 = vmul.f32 %v2483_v62, %v2367_v40  ;;  %v472_v5 = vmul.f32 %v2483_v62, %v2395_v54  ;;  %v470_v27 = vmul.f32 %v2483_v62, %v2352_v31  ;;  %v473_v35 = vmul.f32 %v2483_v62, %v2398_v56 }
 0x28d   :  { %v447_v6 = vadd.f32 %v2494_v3, %v435_v61  ;;  %v448_v7 = vadd.f32 %v2494_v3, %v436_v63  ;;  %v445_v44 = vadd.f32 %v2494_v3, %v433_v0  ;;  %v446_v34 = vadd.f32 %v2494_v3, %v434_v1 }
 0x28e   :  { %v449_v8 = vadd.f32 %v2494_v3, %v437_v2  ;;  %v451_v28 = vadd.f32 %v2494_v3, %v439_v20  ;;  %v480_v45 = vadd.f32 %v2497_v4, %v468_v33  ;;  %v450_v9 = vadd.f32 %v2494_v3, %v438_v24 }
 0x28f   :  { %v2519_v40 = vmax.f32 %v447_v6, 0.0  ;;  %v2521_v10 = vmax.f32 %v448_v7, 0.0  ;;  %v2523_v54 = vmax.f32 %v445_v44, 0.0  ;;  %v2525_v11 = vmax.f32 %v446_v34, 0.0 }
 0x290   :  { %v2527_v12 = vmax.f32 %v449_v8, 0.0  ;;  %v2529_v13 = vmax.f32 %v451_v28, 0.0  ;;  %v2531_v15 = vmax.f32 %v480_v45, 0.0  ;;  %v2533_v17 = vmax.f32 %v450_v9, 0.0 }
 0x291   :  { %v2114_v18 = vpack.i.bf16 %v2521_v10, %v2519_v40  ;;  %v2109_v19 = vpack.i.bf16 %v2525_v11, %v2523_v54  ;;  %v499_v21 = vrot.slane %v2519_v40, 1  ;;  %v500_v22 = vrot.slane %v2521_v10, 1 }
 0x292   :  { %v501_v23 = vrot.slane %v2527_v12, 1  ;;  %v497_v25 = vrot.slane %v2523_v54, 1  ;;  %v498_v26 = vrot.slane %v2525_v11, 1  ;;  %v481_v30 = vadd.f32 %v2497_v4, %v469_v14 }
 0x293   :  { %2115 = vrot.lane.b32.xlu0 %v2114_v18, %s2223_s18  ;;  %2110 = vrot.lane.b32.xlu1 %v2109_v19, %s2223_s18  ;;  %v2550_v29 = vsel %vm514_vm4, %v499_v21, %v500_v22  ;;  %v503_v32 = vrot.slane %v2529_v13, 1  ;;  %v504_v38 = vrot.slane %v2531_v15, 1  ;;  %v502_v47 = vrot.slane %v2533_v17, 1 }
 0x294   :  { %v2558_v36 = vsel %vm514_vm4, %v500_v22, %v501_v23  ;;  %v2562_v31 = vsel %vm514_vm4, %v498_v26, %v499_v21  ;;  %v2568_v37 = vsel %vm514_vm4, %v497_v25, %v498_v26  ;;  %v2575_v43 = vmax.f32 %v481_v30, 0.0 }
 0x295   :  { %v2129_v41 = vpack.i.bf16 %v2558_v36, %v2550_v29  ;;  %v2119_v56 = vpack.i.bf16 %v2562_v31, %v2568_v37  ;;  %v483_v48 = vadd.f32 %v2497_v4, %v471_v39  ;;  %v484_v51 = vadd.f32 %v2497_v4, %v472_v5 }
 0x296   :  { %v482_v52 = vadd.f32 %v2497_v4, %v470_v27  ;;  %v505_v53 = vrot.slane %v2575_v43, 1  ;;  %v485_v55 = vadd.f32 %v2497_v4, %v473_v35  ;;  %v2134_v57 = vpack.i.bf16 %v2531_v15, %v2529_v13 }
 0x297   :  { %2130 = vrot.lane.b32.xlu0 %v2129_v41, %s2225_s3  ;;  %2120 = vrot.lane.b32.xlu1 %v2119_v56, %s2225_s3  ;;  %v2124_v60 = vpack.i.bf16 %v2533_v17, %v2527_v12  ;;  %v2591_v61 = vsel %vm514_vm4, %v503_v32, %v504_v38  ;;  %v2593_v63 = vmax.f32 %v483_v48, 0.0  ;;  %v2597_v0 = vsel %vm514_vm4, %v502_v47, %v503_v32 }
 0x298   :  { %v2601_v1 = vsel %vm514_vm4, %v501_v23, %v502_v47  ;;  %v2603_v2 = vmax.f32 %v484_v51, 0.0  ;;  %v474_v20 = vmul.f32 %v2483_v62, %v2383_v49  ;;  %v2609_v33 = vsel %vm514_vm4, %v504_v38, %v505_v53 }
 0x299   :  { %v2611_v24 = vmax.f32 %v482_v52, 0.0  ;;  %v2613_v14 = vmax.f32 %v485_v55, 0.0  ;;  %v432_v39 = vmul.f32 %v2478_v59, %v2333_v16  ;;  %v507_v5 = vrot.slane %v2593_v63, 1 }
 0x29a   :  { %v486_v6 = vadd.f32 %v2497_v4, %v474_v20  ;;  %v475_v7 = vmul.f32 %v2483_v62, %v2403_v58  ;;  %v692_v44 = vpack.c.bf16 %v2519_v40, %v2525_v11  ;;  %v694_v34 = vpack.c.bf16 %v2529_v13, %v2533_v17 }
 0x29b   :  { %2135 = vrot.lane.b32.xlu0 %v2134_v57, %s2223_s18  ;;  %2125 = vrot.lane.b32.xlu1 %v2124_v60, %s2223_s18  ;;  %v444_v49 = vadd.f32 %v2494_v3, %v432_v39  ;;  %v2149_v16 = vpack.i.bf16 %v2609_v33, %v2591_v61  ;;  %v2139_v59 = vpack.i.bf16 %v2597_v0, %v2601_v1  ;;  %v508_v8 = vrot.slane %v2603_v2, 1  ;;  %v2209_v39 = vld [vmem:[%s3272_s4 + $0x18] sm:$0xff]  }
 0x29c   :  { %v509_v28 = vrot.slane %v2613_v14, 1  ;;  %v506_v3 = vrot.slane %v2611_v24, 1  ;;  %v2639_v58 = vmax.f32 %v486_v6, 0.0  ;;  %v487_v62 = vadd.f32 %v2497_v4, %v475_v7  ;;  %2001 = vmatprep.subr.bf16.mxu1 %v2209_v39  ;;  %v2212_v7 = vld [vmem:[%s3272_s4] sm:$0xff]  }
 0x29d   :  { %v2635_v45 = vmax.f32 %v444_v49, 0.0  ;;  %v693_v9 = vpack.c.bf16 %v2527_v12, %v2521_v10  ;;  %v696_v18 = vpack.c.bf16 %v2593_v63, %v2611_v24  ;;  %v2154_v19 = vpack.i.bf16 %v2603_v2, %v2593_v63  ;;  %2002 = vmatpush3.bf16.msra.mxu1 %v2209_v39  ;;  %v2211_v49 = vld [vmem:[%s3272_s4 + $0x8] sm:$0xff]  }
 0x29e   :  { %v2144_v22 = vpack.i.bf16 %v2611_v24, %v2575_v43  ;;  %v2652_v23 = vmax.f32 %v487_v62, 0.0  ;;  %v695_v4 = vpack.c.bf16 %v2575_v43, %v2531_v15  ;;  %v2660_v27 = vsel %vm514_vm4, %v508_v8, %v509_v28  ;;  %v1805_v15 = vld [vmem:[%s3273_s5] ss:$0 sm:$0xff] }
 0x29f   :  { %2150 = vrot.lane.b32.xlu0 %v2149_v16, %s2225_s3  ;;  %2140 = vrot.lane.b32.xlu1 %v2139_v59, %s2225_s3  ;;  %v691_v21 = vpack.c.bf16 %v2523_v54, %v2635_v45  ;;  %v2664_v30 = vsel %vm514_vm4, %v507_v5, %v508_v8  ;;  %v2668_v32 = vsel %vm514_vm4, %v506_v3, %v507_v5  ;;  %v510_v47 = vrot.slane %v2639_v58, 1  ;;  %v2210_v5 = vld [vmem:[%s3272_s4 + $0x10] sm:$0xff]  }
 0x2a0   :  { %v2672_v35 = vsel %vm514_vm4, %v505_v53, %v506_v3  ;;  %v698_v38 = vpack.c.bf16 %v2652_v23, %v2639_v58  ;;  %v2169_v41 = vpack.i.bf16 %v2660_v27, %v2664_v30  ;;  %v511_v48 = vrot.slane %v2652_v23, 1  ;;  %2003 = vmatprep.subr.bf16.mxu1 %v2210_v5 }
 0x2a1   :  { %v2159_v56 = vpack.i.bf16 %v2668_v32, %v2672_v35  ;;  %v496_v51 = vrot.slane %v2635_v45, 1  ;;  %v2164_v52 = vpack.i.bf16 %v2639_v58, %v2613_v14  ;;  %v2174_v53 = vpack.i.bf16 %v2635_v45, %v2652_v23  ;;  %2004 = vmatpush3.bf16.msra.mxu1 %v2210_v5  ;;  %v2201_v5 = vld [vmem:[%s3271_s1 + $0x8] sm:$0xff]  }
 0x2a2   :  { %v2693_v55 = vsel %vm514_vm4, %v510_v47, %v511_v48  ;;  %v2697_v57 = vsel %vm514_vm4, %v509_v28, %v510_v47  ;;  %2005 = vmatprep.subr.bf16.mxu1 %v2211_v49  ;;  %v3279_v63 = vpack.c.bf16 %v2613_v14, %v2603_v2 }
 0x2a3   :  { %2155 = vrot.lane.b32.xlu0 %v2154_v19, %s2223_s18  ;;  %2145 = vrot.lane.b32.xlu1 %v2144_v22, %s2223_s18  ;;  %v529_v60 = vsel %vm514_vm4, %v496_v51, %v497_v25  ;;  %v2705_v20 = vsel %vm514_vm4, %v511_v48, %v496_v51  ;;  %v2179_v25 = vpack.i.bf16 %v2693_v55, %v2697_v57 }
 0x2a4   :  { %v2184_v6 = vpack.i.bf16 %v529_v60, %v2705_v20 }
 0x2a5   :  { %2006 = vmatpush3.bf16.msra.mxu1 %v2211_v49 }
 0x2a6   :  { %2007 = vmatprep.subr.bf16.mxu1 %v2212_v7 }
 0x2a7   :  { %2170 = vrot.lane.b32.xlu0 %v2169_v41, %s2225_s3  ;;  %2160 = vrot.lane.b32.xlu1 %v2159_v56, %s2225_s3 }
 0x2a9   :  { %2008 = vmatpush3.bf16.msra.mxu1 %v2212_v7 }
 0x2ab   :  { %2165 = vrot.lane.b32.xlu1 %v2164_v52, %s2223_s18  ;;  %2175 = vrot.lane.b32.xlu0 %v2174_v53, %s2223_s18 }
 0x2af   :  { %2180 = vrot.lane.b32.xlu1 %v2179_v25, %s2225_s3  ;;  %2185 = vrot.lane.b32.xlu0 %v2184_v6, %s2225_s3  ;;  %v2202_v25 = vld [vmem:[%s3271_s1] sm:$0xff]  }
 0x305   :  { %v2116_v16 = vpop.permute.xlu0 %2115  ;;  %v2111_v59 = vpop.permute.xlu1 %2110 }
 0x306   :  { %v2118_v8 = vunpack.i.h.bf16 %v2116_v16  ;;  %v2117_v28 = vunpack.i.l.bf16 %v2116_v16  ;;  %v2113_v3 = vunpack.i.h.bf16 %v2111_v59  ;;  %v2112_v62 = vunpack.i.l.bf16 %v2111_v59 }
 0x308   :  { %v661_v51 = vsel %vm333_vm1, %v2562_v31, %v2117_v28  ;;  %v662_v52 = vsel %vm333_vm1, %v2550_v29, %v2118_v8  ;;  %v659_v53 = vsel %vm333_vm1, %v529_v60, %v2112_v62  ;;  %v660_v39 = vsel %vm333_vm1, %v2568_v37, %v2113_v3 }
 0x309   :  { %v2131_v19 = vpop.permute.xlu0 %2130  ;;  %v2121_v22 = vpop.permute.xlu1 %2120 }
 0x30a   :  { %v2133_v41 = vunpack.i.h.bf16 %v2131_v19  ;;  %v2132_v56 = vunpack.i.l.bf16 %v2131_v19  ;;  %v2123_v47 = vunpack.i.h.bf16 %v2121_v22  ;;  %v2122_v48 = vunpack.i.l.bf16 %v2121_v22 }
 0x30c   :  { %v677_v6 = vsel %vm350_vm2, %v661_v51, %v2132_v56  ;;  %v678_v31 = vsel %vm350_vm2, %v662_v52, %v2133_v41  ;;  %v675_v49 = vsel %vm350_vm2, %v659_v53, %v2122_v48  ;;  %v676_v29 = vsel %vm350_vm2, %v660_v39, %v2123_v47 }
 0x30d   :  { %v2136_v60 = vpop.permute.xlu0 %2135  ;;  %v2126_v7 = vpop.permute.xlu1 %2125  ;;  %v700_v16 = vpack.c.bf16 %v678_v31, %v677_v6  ;;  %v699_v37 = vpack.c.bf16 %v676_v29, %v675_v49 }
 0x30e   :  { %v2138_v59 = vunpack.i.h.bf16 %v2136_v60  ;;  %v2137_v8 = vunpack.i.l.bf16 %v2136_v60  ;;  %v2128_v28 = vunpack.i.h.bf16 %v2126_v7  ;;  %v2127_v3 = vunpack.i.l.bf16 %v2126_v7 }
 0x30f   :  { %v772_v62 = vmul.bf16 %v2201_v5, %v700_v16  ;;  %v771_v19 = vmul.bf16 %v2202_v25, %v699_v37  ;;  %v2203_v5 = vld [vmem:[%s3271_s1 + $0x18] sm:$0xff]  }
 0x310   :  { %v666_v51 = vsel %vm333_vm1, %v2591_v61, %v2138_v59  ;;  %v665_v52 = vsel %vm333_vm1, %v2597_v0, %v2137_v8  ;;  %v664_v53 = vsel %vm333_vm1, %v2601_v1, %v2128_v28  ;;  %v663_v39 = vsel %vm333_vm1, %v2558_v36, %v2127_v3 }
 0x311   :  { %v2151_v22 = vpop.permute.xlu0 %2150  ;;  %v2141_v26 = vpop.permute.xlu1 %2140  ;;  %789 = vrot.lane.b32.xlu0 %v772_v62, %s2223_s18  ;;  %787 = vrot.lane.b32.xlu1 %v771_v19, %s2223_s18 }
 0x312   :  { %v2153_v41 = vunpack.i.h.bf16 %v2151_v22  ;;  %v2152_v56 = vunpack.i.l.bf16 %v2151_v22  ;;  %v2143_v48 = vunpack.i.h.bf16 %v2141_v26  ;;  %v2142_v47 = vunpack.i.l.bf16 %v2141_v26  ;;  %v2204_v26 = vld [vmem:[%s3271_s1 + $0x10] sm:$0xff]  }
 0x314   :  { %v681_v25 = vsel %vm350_vm2, %v665_v52, %v2152_v56  ;;  %v682_v61 = vsel %vm350_vm2, %v666_v51, %v2153_v41  ;;  %v679_v0 = vsel %vm350_vm2, %v663_v39, %v2142_v47  ;;  %v680_v6 = vsel %vm350_vm2, %v664_v53, %v2143_v48  ;;  %v2205_v51 = vld [vmem:[%s3271_s1 + $0x28] sm:$0xff]   ;;  %v2206_v52 = vld [vmem:[%s3271_s1 + $0x20] sm:$0xff]  }
 0x315   :  { %v2156_v1 = vpop.permute.xlu0 %2155  ;;  %v2146_v31 = vpop.permute.xlu1 %2145  ;;  %v702_v49 = vpack.c.bf16 %v682_v61, %v681_v25  ;;  %v701_v36 = vpack.c.bf16 %v680_v6, %v679_v0 }
 0x316   :  { %v2158_v29 = vunpack.i.h.bf16 %v2156_v1  ;;  %v2157_v60 = vunpack.i.l.bf16 %v2156_v1  ;;  %v2148_v7 = vunpack.i.h.bf16 %v2146_v31  ;;  %v2147_v16 = vunpack.i.l.bf16 %v2146_v31 }
 0x317   :  { %v774_v37 = vmul.bf16 %v2203_v5, %v702_v49  ;;  %v773_v59 = vmul.bf16 %v2204_v26, %v701_v36 }
 0x318   :  { %v670_v41 = vsel %vm333_vm1, %v2664_v30, %v2158_v29  ;;  %v669_v56 = vsel %vm333_vm1, %v2668_v32, %v2157_v60  ;;  %v668_v48 = vsel %vm333_vm1, %v2672_v35, %v2148_v7  ;;  %v667_v47 = vsel %vm333_vm1, %v2609_v33, %v2147_v16 }
 0x319   :  { %v2171_v8 = vpop.permute.xlu0 %2170  ;;  %v2161_v28 = vpop.permute.xlu1 %2160  ;;  %793 = vrot.lane.b32.xlu0 %v774_v37, %s2223_s18  ;;  %791 = vrot.lane.b32.xlu1 %v773_v59, %s2223_s18 }
 0x31a   :  { %v2173_v3 = vunpack.i.h.bf16 %v2171_v8  ;;  %v2172_v62 = vunpack.i.l.bf16 %v2171_v8  ;;  %v2163_v19 = vunpack.i.h.bf16 %v2161_v28  ;;  %v2162_v22 = vunpack.i.l.bf16 %v2161_v28 }
 0x31c   :  { %v685_v53 = vsel %vm350_vm2, %v669_v56, %v2172_v62  ;;  %v686_v30 = vsel %vm350_vm2, %v670_v41, %v2173_v3  ;;  %v683_v32 = vsel %vm350_vm2, %v667_v47, %v2162_v22  ;;  %v684_v39 = vsel %vm350_vm2, %v668_v48, %v2163_v19  ;;  %v2207_v3 = vld [vmem:[%s3271_s1 + $0x38] sm:$0xff]   ;;  %v2208_v62 = vld [vmem:[%s3271_s1 + $0x30] sm:$0xff]  }
 0x31d   :  { %v2166_v35 = vpop.permute.xlu1 %2165  ;;  %v2176_v5 = vpop.permute.xlu0 %2175  ;;  %v704_v26 = vpack.c.bf16 %v686_v30, %v685_v53  ;;  %v703_v33 = vpack.c.bf16 %v684_v39, %v683_v32 }
 0x31e   :  { %v2168_v25 = vunpack.i.h.bf16 %v2166_v35  ;;  %v2167_v61 = vunpack.i.l.bf16 %v2166_v35  ;;  %v2178_v0 = vunpack.i.h.bf16 %v2176_v5  ;;  %v2177_v6 = vunpack.i.l.bf16 %v2176_v5 }
 0x31f   :  { %v776_v1 = vmul.bf16 %v2205_v51, %v704_v26  ;;  %v775_v31 = vmul.bf16 %v2206_v52, %v703_v33 }
 0x320   :  { %v672_v37 = vsel %vm333_vm1, %v2697_v57, %v2168_v25  ;;  %v671_v59 = vsel %vm333_vm1, %v2660_v27, %v2167_v61  ;;  %v673_v8 = vsel %vm333_vm1, %v2693_v55, %v2177_v6  ;;  %v674_v28 = vsel %vm333_vm1, %v2705_v20, %v2178_v0 }
 0x321   :  { %v2181_v49 = vpop.permute.xlu1 %2180  ;;  %797 = vrot.lane.b32.xlu0 %v776_v1, %s2223_s18  ;;  %v2186_v36 = vpop.permute.xlu0 %2185  ;;  %795 = vrot.lane.b32.xlu1 %v775_v31, %s2223_s18 }
 0x322   :  { %v2183_v29 = vunpack.i.h.bf16 %v2181_v49  ;;  %v2182_v60 = vunpack.i.l.bf16 %v2181_v49  ;;  %v2188_v7 = vunpack.i.h.bf16 %v2186_v36  ;;  %v2187_v16 = vunpack.i.l.bf16 %v2186_v36 }
 0x324   :  { %v687_v19 = vsel %vm350_vm2, %v671_v59, %v2182_v60  ;;  %v688_v57 = vsel %vm350_vm2, %v672_v37, %v2183_v29  ;;  %v690_v27 = vsel %vm350_vm2, %v674_v28, %v2188_v7  ;;  %v689_v22 = vsel %vm350_vm2, %v673_v8, %v2187_v16 }
 0x325   :  { %v706_v55 = vpack.c.bf16 %v690_v27, %v689_v22  ;;  %v705_v41 = vpack.c.bf16 %v688_v57, %v687_v19 }
 0x327   :  { %v778_v56 = vmul.bf16 %v2207_v3, %v706_v55  ;;  %v777_v20 = vmul.bf16 %v2208_v62, %v705_v41 }
 0x329   :  { %801 = vrot.lane.b32.xlu0 %v778_v56, %s2223_s18  ;;  %799 = vrot.lane.b32.xlu1 %v777_v20, %s2223_s18 }
 0x383   :  { %v790_v48 = vpop.permute.xlu0 %789  ;;  %v788_v47 = vpop.permute.xlu1 %787 }
 0x384   :  { %v808_v51 = vsel %vm333_vm1, %v692_v44, %v790_v48  ;;  %v805_v52 = vsel %vm333_vm1, %v691_v21, %v788_v47 }
 0x385   :  { %2009 = vmatprep.mubr.msk.bf16.mxu1 %vm129_vm0, %v805_v52 }
 0x386   :  { %2010 = vmatmul.mubr.msk.bf16.vlgmr.msra.gmra.mxu1 %vm129_vm0, %v808_v51 }
 0x38b   :  { %v794_v53 = vpop.permute.xlu0 %793  ;;  %v792_v30 = vpop.permute.xlu1 %791 }
 0x38c   :  { %v814_v32 = vsel %vm333_vm1, %v694_v34, %v794_v53  ;;  %v811_v40 = vsel %vm333_vm1, %v693_v9, %v792_v30  ;;  %v2227_v30 = vmov 0.0  }
 0x38d   :  { %2013 = vmatprep.mubr.msk.bf16.mxu1 %vm129_vm0, %v811_v40  ;;  %2025 = vmatprep.subr.mxu0 %v2227_v30  ;;  %v1115_v40 = vld [vmem:[%s3274_s6 + $0x30] sm:$0xff] }
 0x38e   :  { %2014 = vmatmul.mubr.msk.bf16.gmra.mxu1 %vm129_vm0, %v814_v32  ;;  %v1116_v32 = vld [vmem:[%s3274_s6 + $0x38] sm:$0xff]  ;;  %2041 = vmatprep.mubr.msk.f32.mxu0 %vm2228_vm5, %v2227_v30 }
 0x38f   :  { %2026 = vmatpush3.msra.mxu0 %v1116_v32 }
 0x390   :  { %2027 = vmatprep.subr.mxu0 %v2227_v30 }
 0x391   :  { %2028 = vmatpush3.msra.mxu0 %v1115_v40 }
 0x392   :  { %2029 = vmatprep.subr.mxu0 %v2227_v30 }
 0x393   :  { %v798_v54 = vpop.permute.xlu0 %797  ;;  %v796_v11 = vpop.permute.xlu1 %795 }
 0x394   :  { %v820_v44 = vsel %vm333_vm1, %v696_v18, %v798_v54  ;;  %v817_v13 = vsel %vm333_vm1, %v695_v4, %v796_v11  ;;  %v1114_v54 = vld [vmem:[%s3274_s6 + $0x28] sm:$0xff]  ;;  %v1113_v11 = vld [vmem:[%s3274_s6 + $0x20] sm:$0xff] }
 0x395   :  { %2017 = vmatprep.mubr.msk.bf16.mxu1 %vm129_vm0, %v817_v13  ;;  %2030 = vmatpush3.msra.mxu0 %v1114_v54  ;;  %v1111_v13 = vld [vmem:[%s3274_s6 + $0x10] sm:$0xff] }
 0x396   :  { %2018 = vmatmul.mubr.msk.bf16.gmra.mxu1 %vm129_vm0, %v820_v44  ;;  %2031 = vmatprep.subr.mxu0 %v2227_v30  ;;  %v1112_v44 = vld [vmem:[%s3274_s6 + $0x18] sm:$0xff] }
 0x397   :  { %2032 = vmatpush3.msra.mxu0 %v1113_v11 }
 0x398   :  { %2033 = vmatprep.subr.mxu0 %v2227_v30 }
 0x399   :  { %2034 = vmatpush3.msra.mxu0 %v1112_v44 }
 0x39a   :  { %2035 = vmatprep.subr.mxu0 %v2227_v30 }
 0x39b   :  { %v802_v10 = vpop.permute.xlu0 %801  ;;  %v800_v12 = vpop.permute.xlu1 %799  ;;  %2036 = vmatpush3.msra.mxu0 %v1111_v13 }
 0x39c   :  { %v826_v17 = vsel %vm333_vm1, %v698_v38, %v802_v10  ;;  %v823_v24 = vsel %vm333_vm1, %v3279_v63, %v800_v12  ;;  %v1110_v10 = vld [vmem:[%s3274_s6 + $0x8] sm:$0xff]  ;;  %2037 = vmatprep.subr.mxu0 %v2227_v30  ;;  %v1109_v12 = vld [vmem:[%s3274_s6] sm:$0xff] }
 0x39d   :  { %2021 = vmatprep.mubr.msk.bf16.mxu1 %vm129_vm0, %v823_v24  ;;  %2038 = vmatpush3.msra.mxu0 %v1110_v10 }
 0x39e   :  { %2022 = vmatmul.mubr.msk.bf16.gmra.mxu1 %vm129_vm0, %v826_v17  ;;  %2039 = vmatprep.subr.mxu0 %v2227_v30 }
 0x39f   :  { %2040 = vmatpush3.msra.mxu0 %v1109_v12 }
 0x3a0   :  { %2068 = vmatprep.subr.mxu0 %v2227_v30 }
 0x446   :  { %v2011_v43 = vpop.f32.mrf.mxu1 }
 0x447   :  { %v2848_v34 = vadd.f32 %v2011_v43, %v1805_v15 }
 0x448   :  { %v914_v45 = vpop.f32.mrf.mxu1 }
 0x449   :  { %v2850_v58 = vadd.f32 %v1805_v15, %v914_v45  ;;  %v981_v9 = vmul.f32 %v2848_v34, %v2848_v34 }
 0x44a   :  { %v2012_v2 = vpop.f32.mrf.mxu1 }
 0x44b   :  { %1015 = vrot.lane.b32.xlu1 %v981_v9, %s2226_s24  ;;  %v2855_v18 = vadd.f32 %v2012_v2, %v1805_v15  ;;  %v979_v23 = vmul.f32 %v2850_v58, %v2850_v58 }
 0x44c   :  { %v917_v14 = vpop.f32.mrf.mxu1 }
 0x44d   :  { %v2857_v21 = vadd.f32 %v1805_v15, %v917_v14  ;;  %v982_v5 = vmul.f32 %v2855_v18, %v2855_v18 }
 0x44e   :  { %v2015_v4 = vpop.f32.mrf.mxu1 }
 0x44f   :  { %1011 = vrot.lane.b32.xlu1 %v979_v23, %s2226_s24  ;;  %v980_v38 = vmul.f32 %v2857_v21, %v2857_v21  ;;  %v2891_v8 = vadd.f32 %v2015_v4, %v1805_v15 }
 0x450   :  { %v930_v39 = vpop.f32.mrf.mxu1 }
 0x451   :  { %v2864_v35 = vadd.f32 %v1805_v15, %v930_v39  ;;  %1013 = vrot.lane.b32.xlu0 %v980_v38, %s2226_s24  ;;  %v985_v22 = vmul.f32 %v2891_v8, %v2891_v8 }
 0x452   :  { %v2016_v26 = vpop.f32.mrf.mxu1 }
 0x453   :  { %1017 = vrot.lane.b32.xlu1 %v982_v5, %s2226_s24  ;;  %v983_v25 = vmul.f32 %v2864_v35, %v2864_v35  ;;  %v2901_v27 = vadd.f32 %v2016_v26, %v1805_v15 }
 0x454   :  { %v933_v33 = vpop.f32.mrf.mxu1 }
 0x455   :  { %v2879_v36 = vadd.f32 %v1805_v15, %v933_v33  ;;  %v986_v20 = vmul.f32 %v2901_v27, %v2901_v27 }
 0x456   :  { %v2019_v61 = vpop.f32.mrf.mxu1 }
 0x457   :  { %v2872_v0 = vadd.f32 %v2019_v61, %v1805_v15  ;;  %1019 = vrot.lane.b32.xlu1 %v983_v25, %s2226_s24  ;;  %v984_v28 = vmul.f32 %v2879_v36, %v2879_v36 }
 0x458   :  { %v946_v6 = vpop.f32.mrf.mxu1 }
 0x459   :  { %v2875_v1 = vadd.f32 %v1805_v15, %v946_v6  ;;  %v989_v31 = vmul.f32 %v2872_v0, %v2872_v0 }
 0x45a   :  { %v2020_v49 = vpop.f32.mrf.mxu1 }
 0x45b   :  { %v2881_v29 = vadd.f32 %v2020_v49, %v1805_v15  ;;  %1031 = vrot.lane.b32.xlu0 %v989_v31, %s2226_s24  ;;  %v987_v60 = vmul.f32 %v2875_v1, %v2875_v1 }
 0x45c   :  { %v949_v7 = vpop.f32.mrf.mxu1 }
 0x45d   :  { %v2886_v16 = vadd.f32 %v1805_v15, %v949_v7  ;;  %1027 = vrot.lane.b32.xlu1 %v987_v60, %s2226_s24  ;;  %v990_v37 = vmul.f32 %v2881_v29, %v2881_v29 }
 0x45e   :  { %v2023_v59 = vpop.f32.mrf.mxu1 }
 0x45f   :  { %1033 = vrot.lane.b32.xlu0 %v990_v37, %s2226_s24  ;;  %v2896_v62 = vadd.f32 %v2023_v59, %v1805_v15  ;;  %v988_v19 = vmul.f32 %v2886_v16, %v2886_v16 }
 0x460   :  { %v962_v3 = vpop.f32.mrf.mxu1 }
 0x461   :  { %1021 = vrot.lane.b32.xlu1 %v984_v28, %s2226_s24  ;;  %v2906_v55 = vadd.f32 %v1805_v15, %v962_v3  ;;  %v993_v41 = vmul.f32 %v2896_v62, %v2896_v62 }
 0x462   :  { %v2024_v57 = vpop.f32.mrf.mxu1 }
 0x463   :  { %1029 = vrot.lane.b32.xlu0 %v988_v19, %s2226_s24  ;;  %v991_v47 = vmul.f32 %v2906_v55, %v2906_v55  ;;  %v2920_v51 = vadd.f32 %v2024_v57, %v1805_v15 }
 0x464   :  { %v965_v56 = vpop.f32.mrf.mxu1 }
 0x465   :  { %1023 = vrot.lane.b32.xlu1 %v985_v22, %s2226_s24  ;;  %v2914_v48 = vadd.f32 %v1805_v15, %v965_v56  ;;  %v994_v53 = vmul.f32 %v2920_v51, %v2920_v51 }
 0x467   :  { %1039 = vrot.lane.b32.xlu0 %v993_v41, %s2226_s24  ;;  %v992_v52 = vmul.f32 %v2914_v48, %v2914_v48 }
 0x469   :  { %1025 = vrot.lane.b32.xlu1 %v986_v20, %s2226_s24 }
 0x46b   :  { %1035 = vrot.lane.b32.xlu0 %v991_v47, %s2226_s24 }
 0x46f   :  { %1037 = vrot.lane.b32.xlu0 %v992_v52, %s2226_s24 }
 0x473   :  { %1041 = vrot.lane.b32.xlu0 %v994_v53, %s2226_s24 }
 0x4bd   :  { %v1016_v17 = vpop.permute.xlu1 %1015 }
 0x4be   :  { %v1061_v23 = vsel %vm129_vm0, %v2848_v34, %v1016_v17 }
 0x4c1   :  { %v1012_v63 = vpop.permute.xlu1 %1011 }
 0x4c2   :  { %v1059_v45 = vsel %vm129_vm0, %v2850_v58, %v1012_v63 }
 0x4c3   :  { %v1014_v24 = vpop.permute.xlu0 %1013 }
 0x4c4   :  { %v1060_v43 = vsel %vm129_vm0, %v2857_v21, %v1014_v24 }
 0x4c5   :  { %v1018_v15 = vpop.permute.xlu1 %1017  ;;  %v1075_v9 = vadd.f32 %v1060_v43, %v1059_v45 }
 0x4c6   :  { %v1062_v5 = vsel %vm129_vm0, %v2855_v18, %v1018_v15 }
 0x4c7   :  { %v1076_v4 = vadd.f32 %v1075_v9, %v1061_v23 }
 0x4c9   :  { %v1020_v2 = vpop.permute.xlu1 %1019  ;;  %v1077_v26 = vadd.f32 %v1076_v4, %v1062_v5 }
 0x4ca   :  { %v1063_v25 = vsel %vm129_vm0, %v2864_v35, %v1020_v2 }
 0x4cb   :  { %v1078_v60 = vadd.f32 %v1077_v26, %v1063_v25 }
 0x4cd   :  { %v1032_v14 = vpop.permute.xlu0 %1031 }
 0x4ce   :  { %v1069_v19 = vsel %vm129_vm0, %v2872_v0, %v1032_v14 }
 0x4cf   :  { %v1028_v38 = vpop.permute.xlu1 %1027 }
 0x4d0   :  { %v1067_v6 = vsel %vm129_vm0, %v2875_v1, %v1028_v38 }
 0x4d1   :  { %v1034_v39 = vpop.permute.xlu0 %1033 }
 0x4d2   :  { %v1070_v52 = vsel %vm129_vm0, %v2881_v29, %v1034_v39 }
 0x4d3   :  { %v1022_v33 = vpop.permute.xlu1 %1021 }
 0x4d4   :  { %v1064_v31 = vsel %vm129_vm0, %v2879_v36, %v1022_v33 }
 0x4d5   :  { %v1030_v61 = vpop.permute.xlu0 %1029  ;;  %v1079_v28 = vadd.f32 %v1078_v60, %v1064_v31  ;;  %v2214_v31 = vld [vmem:[%s3275_s7 + $0x10] sm:$0xff]   ;;  %v2216_v60 = vld [vmem:[%s3275_s7] sm:$0xff]  }
 0x4d6   :  { %v1068_v49 = vsel %vm129_vm0, %v2886_v16, %v1030_v61 }
 0x4d7   :  { %v1088_v7 = vadd.f32 %v1068_v49, %v1067_v6  ;;  %v1024_v37 = vpop.permute.xlu1 %1023  ;;  %v2213_v6 = vld [vmem:[%s3275_s7 + $0x18] sm:$0xff]   ;;  %v2215_v49 = vld [vmem:[%s3275_s7 + $0x8] sm:$0xff]  }
 0x4d8   :  { %v1065_v59 = vsel %vm129_vm0, %v2891_v8, %v1024_v37  ;;  %2044 = vmatprep.subr.bf16.mxu1 %v2213_v6 }
 0x4d9   :  { %v1040_v3 = vpop.permute.xlu0 %1039  ;;  %v1089_v57 = vadd.f32 %v1088_v7, %v1069_v19  ;;  %v1080_v22 = vadd.f32 %v1079_v28, %v1065_v59  ;;  %2045 = vmatpush3.bf16.msra.mxu1 %v2213_v6 }
 0x4da   :  { %v1073_v12 = vsel %vm129_vm0, %v2896_v62, %v1040_v3  ;;  %2046 = vmatprep.subr.bf16.mxu1 %v2214_v31 }
 0x4db   :  { %v1026_v41 = vpop.permute.xlu1 %1025  ;;  %v1090_v40 = vadd.f32 %v1089_v57, %v1070_v52  ;;  %v1820_v52 = vld [vmem:[%s3273_s5 + $0x2] ss:$0 sm:$0xff] }
 0x4dc   :  { %v1066_v56 = vsel %vm129_vm0, %v2901_v27, %v1026_v41 }
 0x4dd   :  { %v1081_v20 = vadd.f32 %v1080_v22, %v1066_v56  ;;  %v1036_v47 = vpop.permute.xlu0 %1035  ;;  %2047 = vmatpush3.bf16.msra.mxu1 %v2214_v31  ;;  %v1819_v22 = vld [vmem:[%s3273_s5 + $0x1] ss:$0 sm:$0xff]  ;;  %v1214_v56 = vsub.s32 2, %v2465_v42 }
 0x4de   :  { %v1071_v53 = vsel %vm129_vm0, %v2906_v55, %v1036_v47  ;;  %2048 = vmatprep.subr.bf16.mxu1 %v2215_v49 }
 0x4df   :  { %v1082_v32 = vrot.slane %v1081_v20, 4  ;;  %v1091_v54 = vadd.f32 %v1090_v40, %v1071_v53  ;;  %v1246_v40 = vsub.s32 3, %v2465_v42 }
 0x4e1   :  { %v1038_v11 = vpop.permute.xlu0 %1037  ;;  %v1083_v13 = vadd.f32 %v1082_v32, %v1081_v20  ;;  %2049 = vmatpush3.bf16.msra.mxu1 %v2215_v49 }
 0x4e2   :  { %v1072_v44 = vsel %vm129_vm0, %v2914_v48, %v1038_v11  ;;  %2050 = vmatprep.subr.bf16.mxu1 %v2216_v60 }
 0x4e3   :  { %v1092_v10 = vadd.f32 %v1091_v54, %v1072_v44  ;;  %v1084_v15 = vrot.slane %v1083_v13, 2 }
 0x4e5   :  { %v1042_v17 = vpop.permute.xlu0 %1041  ;;  %v1093_v63 = vadd.f32 %v1092_v10, %v1073_v12  ;;  %v1085_v9 = vadd.f32 %v1084_v15, %v1083_v13  ;;  %2051 = vmatpush3.bf16.msra.mxu1 %v2216_v60 }
 0x4e6   :  { %v1074_v24 = vsel %vm129_vm0, %v2920_v51, %v1042_v17 }
 0x4e7   :  { %v1094_v43 = vadd.f32 %v1093_v63, %v1074_v24  ;;  %v1086_v23 = vrot.slane %v1085_v9, 1 }
 0x4e9   :  { %v1095_v45 = vrot.slane %v1094_v43, 4  ;;  %v1087_v39 = vadd.f32 %v1086_v23, %v1085_v9 }
 0x4eb   :  { %v1096_v2 = vadd.f32 %v1095_v45, %v1094_v43 }
 0x4ed   :  { %v1097_v14 = vrot.slane %v1096_v2, 2 }
 0x4ef   :  { %v1098_v4 = vadd.f32 %v1097_v14, %v1096_v2 }
 0x4f1   :  { %v1099_v38 = vrot.slane %v1098_v4, 1 }
 0x4f3   :  { %v1100_v5 = vadd.f32 %v1099_v38, %v1098_v4 }
 0x4f5   :  { %v1101_v26 = vsel %vm393_vm3, %v1087_v39, %v1100_v5 }
 0x4f6   :  { %v1103_v33 = vrot.slane %v1101_v26, 6 }
 0x4f8   :  { %1104 = vrot.lane.b32.xlu1 %v1103_v33, %s2226_s24 }
 0x56a   :  { %v1105_v25 = vpop.permute.xlu1 %1104 }
 0x56b   :  { %v1108_v61 = vsel %vm1107_vm6, %v1101_v26, %v1105_v25 }
 0x56c   :  { %2042 = vmatmul.mubr.msk.f32.vlgmr.msra.gmra.mxu0 %vm129_vm0, %v1108_v61 }
 0x56d   :  { %2100 = vmatprep.mubr.msk.f32.mxu0 %vm2228_vm5, %v2227_v30 }
 0x62c   :  { %v1186_v7 = vpop.f32.mrf.mxu0 }
 0x62d   :  { %v1190_v37 = vmul.f32 %v1186_v7, %v1186_v7 }
 0x62e   :  { %v2043_v59 = vpop.f32.mrf.mxu0 }
 0x62f   :  { %v1192_v28 = vrot.slane %v1190_v37, 6 }
 0x631   :  { %v1194_v3 = vsub.f32 %v1186_v7, %v1192_v28 }
 0x633   :  { %v1195_v19 = vmax.f32 %v1194_v3, 0.0 }
 0x635   :  { %v1196_v57 = vadd.f32 1e-05, %v1195_v19 }
 0x637   :  { %2219 = vrsqrt.f32 %v1196_v57 }
 0x644   :  { %v2220_v41 = vpop.eup %2219 }
 0x645   :  { %v1202_v20 = vmul.f32 %v2220_v41, %v1819_v22 }
 0x647   :  { %v1204_v47 = vrot.slane %v1202_v20, 2  ;;  %v1215_v53 = vrot.slane %v1202_v20, %v1214_v56  ;;  %v1247_v17 = vrot.slane %v1202_v20, %v1246_v40 }
 0x649   :  { %v1206_v32 = vmul.f32 %v1204_v47, %v1186_v7  ;;  %v1216_v11 = vmul.f32 %v1215_v53, %v2850_v58  ;;  %v1217_v13 = vmul.f32 %v1215_v53, %v2857_v21  ;;  %v1218_v10 = vmul.f32 %v1215_v53, %v2848_v34 }
 0x64a   :  { %v1219_v12 = vmul.f32 %v1215_v53, %v2855_v18  ;;  %v1220_v63 = vmul.f32 %v1215_v53, %v2864_v35  ;;  %v1221_v24 = vmul.f32 %v1215_v53, %v2879_v36  ;;  %v1222_v39 = vmul.f32 %v1215_v53, %v2891_v8 }
 0x64b   :  { %v1211_v54 = vsub.f32 %v1820_v52, %v1206_v32  ;;  %v1223_v35 = vmul.f32 %v1215_v53, %v2901_v27  ;;  %v1248_v26 = vmul.f32 %v1247_v17, %v2875_v1  ;;  %v1249_v33 = vmul.f32 %v1247_v17, %v2886_v16 }
 0x64c   :  { %v1250_v37 = vmul.f32 %v1247_v17, %v2872_v0  ;;  %v1251_v1 = vmul.f32 %v1247_v17, %v2881_v29  ;;  %v1252_v16 = vmul.f32 %v1247_v17, %v2906_v55  ;;  %v1253_v59 = vmul.f32 %v1247_v17, %v2914_v48 }
 0x64d   :  { %v1227_v44 = vrot.slane %v1211_v54, %v2468_v46  ;;  %v1259_v58 = vrot.slane %v1211_v54, %v2471_v50  ;;  %v1254_v29 = vmul.f32 %v1247_v17, %v2896_v62  ;;  %v1255_v55 = vmul.f32 %v1247_v17, %v2920_v51  ;;  %v1532_v62 = vld [vmem:[%s3276_s9 + $0x70] sm:$0xff]  ;;  %v1531_v51 = vld [vmem:[%s3276_s9 + $0x68] sm:$0xff]  ;;  %v1529_v17 = vld [vmem:[%s3276_s9 + $0x58] sm:$0xff] }
 0x64f   :  { %v1228_v15 = vadd.f32 %v1227_v44, %v1216_v11  ;;  %v1229_v43 = vadd.f32 %v1227_v44, %v1217_v13  ;;  %v1230_v45 = vadd.f32 %v1227_v44, %v1218_v10  ;;  %v1231_v9 = vadd.f32 %v1227_v44, %v1219_v12  ;;  %v1533_v10 = vld [vmem:[%s3276_s9 + $0x78] sm:$0xff]  ;;  %v1530_v12 = vld [vmem:[%s3276_s9 + $0x60] sm:$0xff] }
 0x650   :  { %v1232_v2 = vadd.f32 %v1227_v44, %v1220_v63  ;;  %v1233_v14 = vadd.f32 %v1227_v44, %v1221_v24  ;;  %v1234_v25 = vadd.f32 %v1227_v44, %v1222_v39  ;;  %v1235_v61 = vadd.f32 %v1227_v44, %v1223_v35  ;;  %2069 = vmatpush3.msra.mxu0 %v1533_v10  ;;  %v1528_v63 = vld [vmem:[%s3276_s9 + $0x50] sm:$0xff]  ;;  %v1527_v24 = vld [vmem:[%s3276_s9 + $0x48] sm:$0xff] }
 0x651   :  { %v1236_v21 = vmax.f32 %v1228_v15, 0.0  ;;  %v1237_v23 = vmax.f32 %v1229_v43, 0.0  ;;  %v1238_v34 = vmax.f32 %v1230_v45, 0.0  ;;  %v1239_v4 = vmax.f32 %v1231_v9, 0.0  ;;  %2070 = vmatprep.subr.mxu0 %v2227_v30  ;;  %v1526_v15 = vld [vmem:[%s3276_s9 + $0x40] sm:$0xff]  ;;  %v1525_v43 = vld [vmem:[%s3276_s9 + $0x38] sm:$0xff] }
 0x652   :  { %v1240_v18 = vmax.f32 %v1232_v2, 0.0  ;;  %v1241_v38 = vmax.f32 %v1233_v14, 0.0  ;;  %v1260_v31 = vadd.f32 %v1259_v58, %v1248_v26  ;;  %v1261_v49 = vadd.f32 %v1259_v58, %v1249_v33  ;;  %2071 = vmatpush3.msra.mxu0 %v1532_v62  ;;  %v1524_v45 = vld [vmem:[%s3276_s9 + $0x30] sm:$0xff]  ;;  %v1523_v9 = vld [vmem:[%s3276_s9 + $0x28] sm:$0xff]  ;;  %v1521_v2 = vld [vmem:[%s3276_s9 + $0x18] sm:$0xff] }
 0x653   :  { %v1276_v5 = vpack.c.bf16 %v1237_v23, %v1236_v21  ;;  %v1277_v36 = vpack.c.bf16 %v1239_v4, %v1238_v34  ;;  %v1242_v8 = vmax.f32 %v1234_v25, 0.0  ;;  %v1243_v60 = vmax.f32 %v1235_v61, 0.0  ;;  %2072 = vmatprep.subr.mxu0 %v2227_v30  ;;  %v1520_v14 = vld [vmem:[%s3276_s9 + $0x10] sm:$0xff]  ;;  %v1519_v21 = vld [vmem:[%s3276_s9 + $0x8] sm:$0xff]  ;;  %v1518_v23 = vld [vmem:[%s3276_s9] sm:$0xff] }
 0x654   :  { %v1278_v6 = vpack.c.bf16 %v1241_v38, %v1240_v18  ;;  %v1268_v27 = vmax.f32 %v1260_v31, 0.0  ;;  %v1269_v7 = vmax.f32 %v1261_v49, 0.0  ;;  %v1262_v3 = vadd.f32 %v1259_v58, %v1250_v37  ;;  %2073 = vmatpush3.msra.mxu0 %v1531_v51  ;;  %v3115_v18 = vld [vmem:[%s3277_s8] ss:$0 sm:$0xff] }
 0x655   :  { %2052 = vmatprep.mubr.msk.bf16.mxu1 %vm129_vm0, %v1276_v5  ;;  %v1279_v28 = vpack.c.bf16 %v1243_v60, %v1242_v8  ;;  %v1263_v19 = vadd.f32 %v1259_v58, %v1251_v1  ;;  %v1264_v22 = vadd.f32 %v1259_v58, %v1252_v16  ;;  %v1265_v41 = vadd.f32 %v1259_v58, %v1253_v59 }
 0x656   :  { %2053 = vmatmul.mubr.msk.bf16.vlgmr.msra.gmra.mxu1 %vm129_vm0, %v1277_v36  ;;  %v1280_v57 = vpack.c.bf16 %v1269_v7, %v1268_v27  ;;  %v1270_v20 = vmax.f32 %v1262_v3, 0.0  ;;  %v1266_v48 = vadd.f32 %v1259_v58, %v1254_v29  ;;  %v1267_v32 = vadd.f32 %v1259_v58, %v1255_v55  ;;  %2074 = vmatprep.subr.mxu0 %v2227_v30  ;;  %v1522_v58 = vld [vmem:[%s3276_s9 + $0x20] sm:$0xff] }
 0x657   :  { %2056 = vmatprep.mubr.msk.bf16.mxu1 %vm129_vm0, %v1278_v6  ;;  %v1271_v47 = vmax.f32 %v1263_v19, 0.0  ;;  %v1272_v52 = vmax.f32 %v1264_v22, 0.0  ;;  %v1273_v0 = vmax.f32 %v1265_v41, 0.0  ;;  %2075 = vmatpush3.msra.mxu0 %v1530_v12 }
 0x658   :  { %v1274_v11 = vmax.f32 %v1266_v48, 0.0  ;;  %v1275_v44 = vmax.f32 %v1267_v32, 0.0  ;;  %2076 = vmatprep.subr.mxu0 %v2227_v30 }
 0x659   :  { %v1281_v53 = vpack.c.bf16 %v1271_v47, %v1270_v20  ;;  %v1282_v54 = vpack.c.bf16 %v1273_v0, %v1272_v52  ;;  %2077 = vmatpush3.msra.mxu0 %v1529_v17 }
 0x65a   :  { %v1283_v13 = vpack.c.bf16 %v1275_v44, %v1274_v11  ;;  %2078 = vmatprep.subr.mxu0 %v2227_v30 }
 0x65b   :  { %2079 = vmatpush3.msra.mxu0 %v1528_v63 }
 0x65c   :  { %2080 = vmatprep.subr.mxu0 %v2227_v30 }
 0x65d   :  { %2081 = vmatpush3.msra.mxu0 %v1527_v24 }
 0x65e   :  { %2057 = vmatmul.mubr.msk.bf16.gmra.mxu1 %vm129_vm0, %v1279_v28  ;;  %2082 = vmatprep.subr.mxu0 %v2227_v30 }
 0x65f   :  { %2060 = vmatprep.mubr.msk.bf16.mxu1 %vm129_vm0, %v1280_v57  ;;  %2083 = vmatpush3.msra.mxu0 %v1526_v15 }
 0x660   :  { %2084 = vmatprep.subr.mxu0 %v2227_v30 }
 0x661   :  { %2085 = vmatpush3.msra.mxu0 %v1525_v43 }
 0x662   :  { %2086 = vmatprep.subr.mxu0 %v2227_v30 }
 0x663   :  { %2087 = vmatpush3.msra.mxu0 %v1524_v45 }
 0x664   :  { %2088 = vmatprep.subr.mxu0 %v2227_v30 }
 0x665   :  { %2089 = vmatpush3.msra.mxu0 %v1523_v9 }
 0x666   :  { %2061 = vmatmul.mubr.msk.bf16.gmra.mxu1 %vm129_vm0, %v1281_v53  ;;  %2090 = vmatprep.subr.mxu0 %v2227_v30 }
 0x667   :  { %2064 = vmatprep.mubr.msk.bf16.mxu1 %vm129_vm0, %v1282_v54  ;;  %2091 = vmatpush3.msra.mxu0 %v1522_v58 }
 0x668   :  { %2092 = vmatprep.subr.mxu0 %v2227_v30 }
 0x669   :  { %2093 = vmatpush3.msra.mxu0 %v1521_v2 }
 0x66a   :  { %2094 = vmatprep.subr.mxu0 %v2227_v30 }
 0x66b   :  { %2095 = vmatpush3.msra.mxu0 %v1520_v14 }
 0x66c   :  { %2096 = vmatprep.subr.mxu0 %v2227_v30 }
 0x66d   :  { %2097 = vmatpush3.msra.mxu0 %v1519_v21 }
 0x66e   :  { %2065 = vmatmul.mubr.msk.bf16.gmra.mxu1 %vm129_vm0, %v1283_v13  ;;  %2098 = vmatprep.subr.mxu0 %v2227_v30 }
 0x66f   :  { %2099 = vmatpush3.msra.mxu0 %v1518_v23 }
 0x716   :  { %v2054_v34 = vpop.f32.mrf.mxu1 }
 0x717   :  { %v3121_v5 = vadd.f32 %v2054_v34, %v3115_v18 }
 0x718   :  { %v1379_v4 = vpop.f32.mrf.mxu1 }
 0x719   :  { %v3118_v39 = vadd.f32 %v3115_v18, %v1379_v4  ;;  %v1446_v31 = vmul.f32 %v3121_v5, %v3121_v5 }
 0x71a   :  { %v2055_v38 = vpop.f32.mrf.mxu1 }
 0x71b   :  { %v1444_v26 = vmul.f32 %v3118_v39, %v3118_v39  ;;  %v3129_v33 = vadd.f32 %v2055_v38, %v3115_v18 }
 0x71c   :  { %v1382_v35 = vpop.f32.mrf.mxu1 }
 0x71d   :  { %v3124_v36 = vadd.f32 %v3115_v18, %v1382_v35  ;;  %v1447_v7 = vmul.f32 %v3129_v33, %v3129_v33 }
 0x71e   :  { %v2058_v30 = vpop.f32.mrf.mxu1 }
 0x71f   :  { %v1445_v25 = vmul.f32 %v3124_v36, %v3124_v36  ;;  %v1460_v61 = vadd.f32 %v3124_v36, %v3118_v39  ;;  %v3150_v19 = vadd.f32 %v2058_v30, %v3115_v18 }
 0x720   :  { %v1395_v6 = vpop.f32.mrf.mxu1 }
 0x721   :  { %v1461_v49 = vadd.f32 %v1460_v61, %v3121_v5  ;;  %v1487_v8 = vadd.f32 %v1445_v25, %v1444_v26  ;;  %v3139_v60 = vadd.f32 %v3115_v18, %v1395_v6  ;;  %v1450_v0 = vmul.f32 %v3150_v19, %v3150_v19 }
 0x722   :  { %v2059_v27 = vpop.f32.mrf.mxu1 }
 0x723   :  { %v1488_v37 = vadd.f32 %v1487_v8, %v1446_v31  ;;  %v1462_v1 = vadd.f32 %v1461_v49, %v3129_v33  ;;  %v1448_v59 = vmul.f32 %v3139_v60, %v3139_v60  ;;  %v3158_v29 = vadd.f32 %v2059_v27, %v3115_v18 }
 0x724   :  { %v1398_v16 = vpop.f32.mrf.mxu1 }
 0x725   :  { %v1489_v28 = vadd.f32 %v1488_v37, %v1447_v7  ;;  %v3147_v3 = vadd.f32 %v3115_v18, %v1398_v16  ;;  %v1463_v57 = vadd.f32 %v1462_v1, %v3139_v60  ;;  %v1451_v13 = vmul.f32 %v3158_v29, %v3158_v29 }
 0x726   :  { %v2062_v22 = vpop.f32.mrf.mxu1 }
 0x727   :  { %v1490_v41 = vadd.f32 %v1489_v28, %v1448_v59  ;;  %v1449_v20 = vmul.f32 %v3147_v3, %v3147_v3  ;;  %v1464_v55 = vadd.f32 %v1463_v57, %v3147_v3  ;;  %v3165_v11 = vadd.f32 %v2062_v22, %v3115_v18 }
 0x728   :  { %v1411_v47 = vpop.f32.mrf.mxu1 }
 0x729   :  { %v1491_v52 = vadd.f32 %v1490_v41, %v1449_v20  ;;  %v3162_v48 = vadd.f32 %v3115_v18, %v1411_v47  ;;  %v1465_v10 = vadd.f32 %v1464_v55, %v3150_v19  ;;  %v1454_v43 = vmul.f32 %v3165_v11, %v3165_v11 }
 0x72a   :  { %v2063_v53 = vpop.f32.mrf.mxu1 }
 0x72b   :  { %v1492_v32 = vadd.f32 %v1491_v52, %v1450_v0  ;;  %v1452_v51 = vmul.f32 %v3162_v48, %v3162_v48  ;;  %v3176_v12 = vadd.f32 %v2063_v53, %v3115_v18  ;;  %v1466_v58 = vadd.f32 %v1465_v10, %v3158_v29 }
 0x72c   :  { %v1414_v54 = vpop.f32.mrf.mxu1 }
 0x72d   :  { %v3168_v44 = vadd.f32 %v3115_v18, %v1414_v54  ;;  %v1493_v24 = vadd.f32 %v1492_v32, %v1451_v13  ;;  %v1455_v21 = vmul.f32 %v3176_v12, %v3176_v12  ;;  %v1467_v6 = vrot.slane %v1466_v58, 4 }
 0x72e   :  { %v2066_v62 = vpop.f32.mrf.mxu1 }
 0x72f   :  { %v1453_v17 = vmul.f32 %v3168_v44, %v3168_v44  ;;  %v1473_v63 = vadd.f32 %v3168_v44, %v3162_v48  ;;  %v1494_v4 = vrot.slane %v1493_v24, 4  ;;  %v3193_v38 = vadd.f32 %v2066_v62, %v3115_v18 }
 0x730   :  { %v1427_v15 = vpop.f32.mrf.mxu1  ;;  %v1468_v59 = vadd.f32 %v1467_v6, %v1466_v58 }
 0x731   :  { %v1474_v45 = vadd.f32 %v1473_v63, %v3165_v11  ;;  %v1500_v9 = vadd.f32 %v1453_v17, %v1452_v51  ;;  %v3187_v2 = vadd.f32 %v3115_v18, %v1427_v15  ;;  %v1495_v7 = vadd.f32 %v1494_v4, %v1493_v24 }
 0x732   :  { %v2067_v14 = vpop.f32.mrf.mxu1  ;;  %v1458_v37 = vmul.f32 %v3193_v38, %v3193_v38  ;;  %v1469_v47 = vrot.slane %v1468_v59, 2 }
 0x733   :  { %v1501_v23 = vadd.f32 %v1500_v9, %v1454_v43  ;;  %v1475_v34 = vadd.f32 %v1474_v45, %v3176_v12  ;;  %v1456_v30 = vmul.f32 %v3187_v2, %v3187_v2  ;;  %v3202_v49 = vadd.f32 %v2067_v14, %v3115_v18 }
 0x734   :  { %v1430_v35 = vpop.f32.mrf.mxu1  ;;  %v1496_v22 = vrot.slane %v1495_v7, 2  ;;  %v1470_v13 = vadd.f32 %v1469_v47, %v1468_v59 }
 0x735   :  { %v1476_v26 = vadd.f32 %v1475_v34, %v3187_v2  ;;  %v1502_v25 = vadd.f32 %v1501_v23, %v1455_v21  ;;  %v3199_v61 = vadd.f32 %v3115_v18, %v1430_v35  ;;  %v1459_v28 = vmul.f32 %v3202_v49, %v3202_v49 }
 0x736   :  { %v1497_v32 = vadd.f32 %v1496_v22, %v1495_v7  ;;  %v1471_v63 = vrot.slane %v1470_v13, 1 }
 0x737   :  { %v1503_v31 = vadd.f32 %v1502_v25, %v1456_v30  ;;  %v1457_v8 = vmul.f32 %v3199_v61, %v3199_v61  ;;  %v1477_v27 = vadd.f32 %v1476_v26, %v3199_v61 }
 0x738   :  { %v1498_v51 = vrot.slane %v1497_v32, 1  ;;  %v1472_v9 = vadd.f32 %v1471_v63, %v1470_v13 }
 0x739   :  { %v1478_v1 = vadd.f32 %v1477_v27, %v3193_v38  ;;  %v1504_v16 = vadd.f32 %v1503_v31, %v1457_v8  ;;  %v1834_v31 = vld [vmem:[%s3277_s8 + $0x1] ss:$0 sm:$0xff] }
 0x73a   :  { %v1499_v43 = vadd.f32 %v1498_v51, %v1497_v32 }
 0x73b   :  { %v1479_v57 = vadd.f32 %v1478_v1, %v3202_v49  ;;  %v1505_v18 = vadd.f32 %v1504_v16, %v1458_v37  ;;  %v1835_v1 = vld [vmem:[%s3277_s8 + $0x2] ss:$0 sm:$0xff] }
 0x73d   :  { %v1480_v41 = vrot.slane %v1479_v57, 4  ;;  %v1506_v20 = vadd.f32 %v1505_v18, %v1459_v28 }
 0x73f   :  { %v1481_v52 = vadd.f32 %v1480_v41, %v1479_v57  ;;  %v1507_v0 = vrot.slane %v1506_v20, 4 }
 0x741   :  { %v1482_v55 = vrot.slane %v1481_v52, 2  ;;  %v1508_v53 = vadd.f32 %v1507_v0, %v1506_v20 }
 0x743   :  { %v1509_v54 = vrot.slane %v1508_v53, 2  ;;  %v1483_v10 = vadd.f32 %v1482_v55, %v1481_v52 }
 0x745   :  { %v1484_v62 = vrot.slane %v1483_v10, 1  ;;  %v1510_v17 = vadd.f32 %v1509_v54, %v1508_v53 }
 0x747   :  { %v1511_v24 = vrot.slane %v1510_v17, 1  ;;  %v1485_v15 = vadd.f32 %v1484_v62, %v1483_v10 }
 0x749   :  { %v1512_v45 = vadd.f32 %v1511_v24, %v1510_v17  ;;  %v1486_v21 = vsel %vm393_vm3, %v1472_v9, %v1485_v15 }
 0x74b   :  { %v1513_v58 = vsel %vm393_vm3, %v1499_v43, %v1512_v45 }
 0x74c   :  { %v1515_v14 = vrot.slane %v1513_v58, 6 }
 0x74e   :  { %v1517_v23 = vsel %vm1107_vm6, %v1486_v21, %v1515_v14 }
 0x74f   :  { %2101 = vmatmul.mubr.f32.vlgmr.msra.gmra.mxu0 %v1517_v23 }
 0x80f   :  { %v1600_v34 = vpop.f32.mrf.mxu0 }
 0x810   :  { %v1604_v4 = vmul.f32 %v1600_v34, %v1600_v34 }
 0x811   :  { %v2102_v35 = vpop.f32.mrf.mxu0 }
 0x812   :  { %v1606_v30 = vrot.slane %v1604_v4, 6 }
 0x814   :  { %v1608_v26 = vsub.f32 %v1600_v34, %v1606_v30 }
 0x816   :  { %v1609_v25 = vmax.f32 %v1608_v26, 0.0 }
 0x818   :  { %v1610_v6 = vadd.f32 1e-05, %v1609_v25 }
 0x81a   :  { %2221 = vrsqrt.f32 %v1610_v6 }
 0x827   :  { %v2222_v8 = vpop.eup %2221 }
 0x828   :  { %v1616_v27 = vmul.f32 %v2222_v8, %v1834_v31 }
 0x82a   :  { %v1618_v7 = vrot.slane %v1616_v27, 2  ;;  %v1629_v37 = vrot.slane %v1616_v27, %v1214_v56  ;;  %v1661_v16 = vrot.slane %v1616_v27, %v1246_v40 }
 0x82c   :  { %v1620_v59 = vmul.f32 %v1618_v7, %v1600_v34  ;;  %v1630_v28 = vmul.f32 %v1629_v37, %v3118_v39  ;;  %v1631_v57 = vmul.f32 %v1629_v37, %v3124_v36  ;;  %v1632_v18 = vmul.f32 %v1629_v37, %v3121_v5 }
 0x82d   :  { %v1633_v41 = vmul.f32 %v1629_v37, %v3129_v33  ;;  %v1634_v20 = vmul.f32 %v1629_v37, %v3139_v60  ;;  %v1635_v56 = vmul.f32 %v1629_v37, %v3147_v3  ;;  %v1636_v47 = vmul.f32 %v1629_v37, %v3150_v19 }
 0x82e   :  { %v1625_v22 = vsub.f32 %v1835_v1, %v1620_v59  ;;  %v1637_v52 = vmul.f32 %v1629_v37, %v3158_v29  ;;  %v1662_v42 = vmul.f32 %v1661_v16, %v3162_v48  ;;  %v1663_v40 = vmul.f32 %v1661_v16, %v3168_v44 }
 0x82f   :  { %v1664_v36 = vmul.f32 %v1661_v16, %v3165_v11  ;;  %v1665_v5 = vmul.f32 %v1661_v16, %v3176_v12  ;;  %v1666_v33 = vmul.f32 %v1661_v16, %v3187_v2  ;;  %v1667_v60 = vmul.f32 %v1661_v16, %v3199_v61 }
 0x830   :  { %v1641_v39 = vrot.slane %v1625_v22, %v2468_v46  ;;  %v1668_v3 = vmul.f32 %v1661_v16, %v3193_v38  ;;  %v1669_v19 = vmul.f32 %v1661_v16, %v3202_v49  ;;  %v1673_v29 = vrot.slane %v1625_v22, %v2471_v50 }
 0x832   :  { %v1642_v0 = vadd.f32 %v1641_v39, %v1630_v28  ;;  %v1643_v48 = vadd.f32 %v1641_v39, %v1631_v57  ;;  %v1644_v55 = vadd.f32 %v1641_v39, %v1632_v18  ;;  %v1645_v44 = vadd.f32 %v1641_v39, %v1633_v41 }
 0x833   :  { %v1646_v53 = vadd.f32 %v1641_v39, %v1634_v20  ;;  %v1647_v46 = vadd.f32 %v1641_v39, %v1635_v56  ;;  %v1648_v32 = vadd.f32 %v1641_v39, %v1636_v47  ;;  %v1649_v11 = vadd.f32 %v1641_v39, %v1637_v52 }
 0x834   :  { %v1650_v54 = vmax.f32 %v1642_v0, 0.0  ;;  %v1651_v12 = vmax.f32 %v1643_v48, 0.0  ;;  %v1652_v13 = vmax.f32 %v1644_v55, 0.0  ;;  %v1653_v2 = vmax.f32 %v1645_v44, 0.0 }
 0x835   :  { %v1654_v10 = vmax.f32 %v1646_v53, 0.0  ;;  %v1655_v61 = vmax.f32 %v1647_v46, 0.0  ;;  %v1656_v62 = vmax.f32 %v1648_v32, 0.0  ;;  %v1657_v38 = vmax.f32 %v1649_v11, 0.0 }
 0x836   :  { %v1674_v51 = vadd.f32 %v1673_v29, %v1662_v42  ;;  %v1675_v49 = vadd.f32 %v1673_v29, %v1663_v40  ;;  %v1676_v17 = vadd.f32 %v1673_v29, %v1664_v36  ;;  %v1677_v50 = vadd.f32 %v1673_v29, %v1665_v5 }
 0x837   :  { %v1678_v63 = vadd.f32 %v1673_v29, %v1666_v33  ;;  %v1679_v24 = vadd.f32 %v1673_v29, %v1667_v60  ;;  %v1680_v15 = vadd.f32 %v1673_v29, %v1668_v3  ;;  %v1681_v43 = vadd.f32 %v1673_v29, %v1669_v19 }
 0x838   :  { %v1682_v45 = vmax.f32 %v1674_v51, 0.0  ;;  %v1683_v9 = vmax.f32 %v1675_v49, 0.0  ;;  %v1684_v58 = vmax.f32 %v1676_v17, 0.0  ;;  %v1685_v14 = vmax.f32 %v1677_v50, 0.0 }
 0x839   :  { %v1686_v21 = vmax.f32 %v1678_v63, 0.0  ;;  %v1687_v23 = vmax.f32 %v1679_v24, 0.0  ;;  %v1688_v34 = vmax.f32 %v1680_v15, 0.0  ;;  %v1689_v4 = vmax.f32 %v1681_v43, 0.0 }
 0x83a   :  { %v1871_v35 = vpack.c.bf16 %v1651_v12, %v1650_v54  ;;  %v1876_v30 = vpack.c.bf16 %v1653_v2, %v1652_v13  ;;  %v1881_v26 = vpack.c.bf16 %v1655_v61, %v1654_v10  ;;  %v1886_v25 = vpack.c.bf16 %v1657_v38, %v1656_v62 }
 0x83b   :  { %v1891_v6 = vpack.c.bf16 %v1683_v9, %v1682_v45  ;;  %v1896_v31 = vpack.c.bf16 %v1685_v14, %v1684_v58  ;;  %v1901_v8 = vpack.c.bf16 %v1687_v23, %v1686_v21  ;;  %v1906_v27 = vpack.c.bf16 %v1689_v4, %v1688_v34 }
 0x83c   :  { %1872 = vst [vmem:[%s3278_s10] sm:$0xff] %v1871_v35   ;;  %1908 = vst [vmem:[%s3278_s10 + $0x8] sm:$0xff] %v1876_v30  }
 0x83d   :  { %1909 = vst [vmem:[%s3278_s10 + $0x10] sm:$0xff] %v1881_v26   ;;  %1910 = vst [vmem:[%s3278_s10 + $0x18] sm:$0xff] %v1886_v25  }
 0x83e   :  { %1911 = vst [vmem:[%s3278_s10 + $0x20] sm:$0xff] %v1891_v6   ;;  %1912 = vst [vmem:[%s3278_s10 + $0x28] sm:$0xff] %v1896_v31  }
 0x83f   :  { %1913 = vst [vmem:[%s3278_s10 + $0x30] sm:$0xff] %v1901_v8   ;;  %1914 = vst [vmem:[%s3278_s10 + $0x38] sm:$0xff] %v1906_v27  }

</bundles_post_ra>
